<compile_context>
chip_gen: v6e
topology: v6e:2x2x1
jax: 0.10.0
libtpu: 0.0.40
codegen_flags: <defaults>
</compile_context>

<pallas_src>
import jax
import jax.numpy as jnp
import numpy as np
from jax.experimental import pallas as pl
from jax.experimental.pallas import tpu as pltpu


def _round_up(x, m):
    return (x + m - 1) // m * m


def _pick_bt(B, Hep, target_m=256):
    """Images folded per grid step (stage-1 MXU M = Bt*Hep).  Keep >= 2 grid
    steps when possible so v7x's two TensorCores both get a full matmul."""
    divs = [d for d in range(1, B + 1) if B % d == 0]
    fit = [d for d in divs if d * Hep <= target_m]
    bt = max(fit) if fit else 1
    if B // bt < 2:
        smaller = [d for d in divs if B // d >= 2]
        if smaller:
            bt = max(smaller)
    return bt


def nchw_to_rows(a):
    """(B, C, H, W) -> lane-dense rows (B, H, W*C), channel fastest."""
    B, C, H, W = a.shape
    return jnp.transpose(a, (0, 2, 3, 1)).reshape(B, H, W * C)


def rows_to_nchw(a, C):
    """(B, H, W*C) -> (B, C, H, W)."""
    B, H, WC = a.shape
    W = WC // C
    return jnp.transpose(a.reshape(B, H, W, C), (0, 3, 1, 2))


def prepare_convgru_weights(w_r, b_r, w_u, b_u, w_o, b_o, W):
    """Expand the KxK conv weights into block-banded row-matmul matrices.

    Call ONCE per sequence (weights are constant across recurrent steps).
    Conv weights are OIHW with input channels ordered [x (Ci) | h (Ch)],
    matching torch.cat([input_, hidden], dim=1).
    """
    Ch = w_r.shape[0]
    Ci = w_r.shape[1] - Ch
    K = w_r.shape[2]
    p = K // 2
    WCh = W * Ch
    f32 = jnp.float32

    # Selector T[a, j, q] = 1 iff input width-column a feeds output column j
    # through width-tap q (zero outside the band == "same" zero padding in W).
    a_i = np.arange(W)[:, None, None]
    j_i = np.arange(W)[None, :, None]
    q_i = np.arange(K)[None, None, :]
    T = (a_i - j_i == q_i - p).astype(np.float32)              # (W, W, K)

    def band(w_part, Cin):
        # (Ch, Cin, K, K) -> (K, W*Cin, W*Ch), banded over the width dim.
        w_t = jnp.transpose(w_part, (2, 3, 1, 0)).astype(f32)  # (K, Kw, Cin, Ch)
        bmat = jnp.einsum('ajq,kqco->kacjo', T, w_t)           # (K, W, Cin, W, Ch)
        return bmat.reshape(K, W * Cin, WCh)

    wrx, wrh = band(w_r[:, :Ci], Ci), band(w_r[:, Ci:], Ch)
    wux, wuh = band(w_u[:, :Ci], Ci), band(w_u[:, Ci:], Ch)
    wox, woh = band(w_o[:, :Ci], Ci), band(w_o[:, Ci:], Ch)

    # Fused reset|update weight acting on the stacked [h | x] row:
    #   contraction rows [0, WCh) = h part, [WCh, WCh+WCi) = x part,
    #   output cols [0, WCh) = reset, [WCh, 2*WCh) = update.
    w_ru = jnp.concatenate(
        [jnp.concatenate([wrh, wuh], axis=2),
         jnp.concatenate([wrx, wux], axis=2)],
        axis=1).astype(jnp.bfloat16)                           # (K, WCh+WCi, 2*WCh)

    # Fused out-gate weight acting on the [h*reset | x] row.
    w_out = jnp.concatenate([woh, wox], axis=1).astype(jnp.bfloat16)  # (K, WCh+WCi, WCh)

    b_ru = jnp.concatenate([jnp.tile(b_r.astype(f32), W),
                            jnp.tile(b_u.astype(f32), W)]).reshape(1, 2 * WCh)
    b_o_row = jnp.tile(b_o.astype(f32), W).reshape(1, WCh)

    return dict(w_ru=w_ru, w_out=w_out, b_ru=b_ru, b_o=b_o_row,
                K=K, Ci=Ci, Ch=Ch, W=W)


def _make_convgru_kernel(H, W, K, Ci, Ch, Bt, Hep):
    """Kernel for one grid step = Bt images, banded row-matmul formulation."""
    p = K // 2
    WCi, WCh = W * Ci, W * Ch
    bf16, f32 = jnp.bfloat16, jnp.float32

    def kernel(st_ref, wru_ref, wo_ref, bru_ref, bo_ref, out_ref, ru_ref):
        # st_ref: (Bt, R, WCh+WCi) f32; per image, lanes [0,WCh)=h, [WCh,..)=x,
        # rows: 2p zero halo | H real rows | >=2p zero halo (padded row r <-> real r-2p).

        # ---- stage 1: fused reset|update gates, one MXU dot per row-tap -------
        ru_lin = None
        for kh in range(K):                                    # static unroll
            if Bt == 1:
                lhs = st_ref[0, kh:kh + Hep, :]
            else:
                lhs = jnp.concatenate(
                    [st_ref[j, kh:kh + Hep, :] for j in range(Bt)], axis=0)
            d = jnp.dot(lhs.astype(bf16), wru_ref[kh],
                        preferred_element_type=f32)            # (Bt*Hep, 2*WCh)
            ru_lin = d if ru_lin is None else ru_lin + d
        ru_ref[...] = jax.nn.sigmoid(ru_lin + bru_ref[...])    # VMEM scratch

        # ---- stage 2: out gate on [h*reset | x], one MXU dot per row-tap ------
        o_lin = None
        for kh in range(K):
            pieces = []
            for j in range(Bt):
                hs = st_ref[j, kh + p:kh + p + H, :WCh]        # shifted h rows (f32)
                xs = st_ref[j, kh + p:kh + p + H, WCh:]        # shifted x rows (f32)
                r = ru_ref[j * Hep + kh:j * Hep + kh + H, :WCh]  # matching reset rows
                hr = (hs * r).astype(bf16)
                pieces.append(jnp.concatenate([hr, xs.astype(bf16)], axis=-1))
            lhs = pieces[0] if Bt == 1 else jnp.concatenate(pieces, axis=0)
            d = jnp.dot(lhs, wo_ref[kh], preferred_element_type=f32)  # (Bt*H, WCh)
            o_lin = d if o_lin is None else o_lin + d
        out = jnp.tanh(o_lin + bo_ref[...])                    # out_gate_activation

        # ---- new hidden state: h*(1-u) + out*u (invert_update_gate=False) -----
        for j in range(Bt):
            h_real = st_ref[j, 2 * p:2 * p + H, :WCh]          # exact f32 state
            upd = ru_ref[j * Hep + p:j * Hep + p + H, WCh:]
            o_j = out[j * H:(j + 1) * H, :]
            out_ref[j] = h_real * (1.0 - upd) + o_j * upd      # lane-dense store

    return kernel


def convgru_step_rows(x_rows, h_rows, params, H, *, single_buffer_weights=True):
    """One ConvGRUCell step on lane-dense rows.

    x_rows: (B, H, W*Ci), h_rows: (B, H, W*Ch) -> new h rows (B, H, W*Ch) f32.
    """
    K, Ci, Ch, W = params["K"], params["Ci"], params["Ch"], params["W"]
    p = K // 2
    WCi, WCh = W * Ci, W * Ch
    C = WCh + WCi
    B = x_rows.shape[0]
    He = H + 2 * p
    Hep = _round_up(max(He, 8), 8)      # gate rows per image, 8-aligned sublanes
    R = Hep + 2 * p                     # stacked rows per image incl. zero halo
    Bt = _pick_bt(B, Hep)

    f32 = jnp.float32
    # lane-dense [h | x] rows with a zero row-halo (2p top, >=2p bottom)
    stacked = jnp.concatenate([h_rows.astype(f32), x_rows.astype(f32)], axis=-1)
    stacked = jnp.pad(stacked, ((0, 0), (2 * p, R - 2 * p - H), (0, 0)))

    w_ru, w_out = params["w_ru"], params["w_out"]
    b_ru, b_o = params["b_ru"], params["b_o"]

    def _wspec(shape):
        idx = lambda g: (0,) * len(shape)
        if single_buffer_weights:
            # grid-invariant operand -> single VMEM buffer (no double-buffering)
            return pl.BlockSpec(shape, idx, pipeline_mode=pl.Buffered(1))
        return pl.BlockSpec(shape, idx)

    # Explicit scoped-VMEM budget (bf16 weights single-buffered, acts doubled).
    est = ((w_ru.size + w_out.size) * 2
           + (b_ru.size + b_o.size) * 4 * 2
           + Bt * R * C * 4 * 2
           + Bt * H * WCh * 4 * 2
           + Bt * Hep * 2 * WCh * 4)
    vmem_limit = int(min(max(2 * est, 32 * 1024 * 1024), 56 * 1024 * 1024))

    kernel = _make_convgru_kernel(H, W, K, Ci, Ch, Bt, Hep)

    return pl.pallas_call(
        kernel,
        out_shape=jax.ShapeDtypeStruct((B, H, WCh), f32),
        grid=(B // Bt,),
        in_specs=[
            pl.BlockSpec((Bt, R, C), lambda g: (g, 0, 0)),      # stacked rows
            _wspec((K, C, 2 * WCh)),                            # fused r|u weight
            _wspec((K, C, WCh)),                                # fused out weight
            pl.BlockSpec((1, 2 * WCh), lambda g: (0, 0)),       # bias r|u
            pl.BlockSpec((1, WCh), lambda g: (0, 0)),           # bias o
        ],
        out_specs=pl.BlockSpec((Bt, H, WCh), lambda g: (g, 0, 0)),
        scratch_shapes=[pltpu.VMEM((Bt * Hep, 2 * WCh), f32)],  # reset|update gates
        compiler_params=pltpu.CompilerParams(
            dimension_semantics=("parallel",),                  # v7x: 2 TCs over grid
            vmem_limit_bytes=vmem_limit),
    )(stacked, w_ru, w_out, b_ru, b_o)


def convgru_cell_pallas(x_nchw, h_nchw, w_r, b_r, w_u, b_u, w_o, b_o,
                        *, single_buffer_weights=True):
    """Convenience single-call NCHW API.  For a recurrent rollout, hoist
    prepare_convgru_weights() and keep h in row layout between steps."""
    B, Ci, H, W = x_nchw.shape
    Ch = h_nchw.shape[1]
    params = prepare_convgru_weights(w_r, b_r, w_u, b_u, w_o, b_o, W)
    h_new = convgru_step_rows(nchw_to_rows(x_nchw), nchw_to_rows(h_nchw),
                              params, H, single_buffer_weights=single_buffer_weights)
    return rows_to_nchw(h_new, Ch)


# ----------------------------- references -----------------------------------

def convgru_cell_ref(x, h, w_r, b_r, w_u, b_u, w_o, b_o):
    """Pure-JAX f32/HIGHEST reference mirroring the PyTorch forward."""
    def conv(inp, w, b):
        y = jax.lax.conv_general_dilated(
            inp, w, (1, 1), 'SAME',
            dimension_numbers=('NCHW', 'OIHW', 'NCHW'),
            precision=jax.lax.Precision.HIGHEST)
        return y + b[None, :, None, None]

    stacked = jnp.concatenate([x, h], axis=1)
    update = jax.nn.sigmoid(conv(stacked, w_u, b_u))
    reset = jax.nn.sigmoid(conv(stacked, w_r, b_r))
    out = jnp.tanh(conv(jnp.concatenate([x, h * reset], axis=1), w_o, b_o))
    return h * (1.0 - update) + out * update


def convgru_cell_ref_bf16(x, h, w_r, b_r, w_u, b_u, w_o, b_o):
    """Reference at the kernel's numerics (bf16 conv operands, f32 accumulate,
    f32 elementwise) — tight tolerance check that catches indexing bugs."""
    bf16 = jnp.bfloat16

    def conv(inp, w, b):
        y = jax.lax.conv_general_dilated(
            inp.astype(bf16), w.astype(bf16), (1, 1), 'SAME',
            dimension_numbers=('NCHW', 'OIHW', 'NCHW'),
            preferred_element_type=jnp.float32)
        return y + b[None, :, None, None].astype(jnp.float32)

    stacked = jnp.concatenate([x, h], axis=1)
    update = jax.nn.sigmoid(conv(stacked, w_u, b_u))
    reset = jax.nn.sigmoid(conv(stacked, w_r, b_r))
    out = jnp.tanh(conv(jnp.concatenate([x, h * reset], axis=1), w_o, b_o))
    return h * (1.0 - update) + out * update


# --------------------------------- main --------------------------------------

if __name__ == "__main__":
    # Small shapes consistent with the module: Conv2d(input_size + hidden, hidden, k)
    B, Ci, H, W = 2, 4, 16, 16
    Ch, K = 8, 3

    key = jax.random.PRNGKey(0)
    kx, kr, ku, ko, kbr, kbu, kbo = jax.random.split(key, 7)

    x = jax.random.normal(kx, (B, Ci, H, W), dtype=jnp.float32)
    h0 = jnp.zeros((B, Ch, H, W), dtype=jnp.float32)   # module's first-call init

    w_r = 0.1 * jax.random.normal(kr, (Ch, Ci + Ch, K, K), dtype=jnp.float32)
    w_u = 0.1 * jax.random.normal(ku, (Ch, Ci + Ch, K, K), dtype=jnp.float32)
    w_o = 0.1 * jax.random.normal(ko, (Ch, Ci + Ch, K, K), dtype=jnp.float32)
    b_r = 0.1 * jax.random.normal(kbr, (Ch,), dtype=jnp.float32)
    b_u = 0.1 * jax.random.normal(kbu, (Ch,), dtype=jnp.float32)
    b_o = 0.1 * jax.random.normal(kbo, (Ch,), dtype=jnp.float32)

    # Hoisted once per sequence: banded bf16 weights + row-layout conversion.
    params = prepare_convgru_weights(w_r, b_r, w_u, b_u, w_o, b_o, W)
    x_rows, h0_rows = nchw_to_rows(x), nchw_to_rows(h0)

    def make_step(single_buffer):
        @jax.jit
        def step(xr, hr):
            return convgru_step_rows(xr, hr, params, H,
                                     single_buffer_weights=single_buffer)
        return step

    single_buffer = True
    step = make_step(single_buffer)
    try:
        h1_rows = jax.block_until_ready(step(x_rows, h0_rows))
    except Exception:
        # JAX build without BlockSpec pipeline_mode / Buffered(1): fall back to
        # default double-buffered weights (same results, just more VMEM).
        single_buffer = False
        step = make_step(single_buffer)
        h1_rows = jax.block_until_ready(step(x_rows, h0_rows))

    h2_rows = jax.block_until_ready(step(x_rows, h1_rows))   # recurrent step, h != 0

    h1 = rows_to_nchw(h1_rows, Ch)
    h2 = rows_to_nchw(h2_rows, Ch)
    assert h1.shape == (B, Ch, H, W) and h1.dtype == jnp.float32

    h1_ref = convgru_cell_ref(x, h0, w_r, b_r, w_u, b_u, w_o, b_o)
    h2_ref = convgru_cell_ref(x, h1_ref, w_r, b_r, w_u, b_u, w_o, b_o)
    h1_refb = convgru_cell_ref_bf16(x, h0, w_r, b_r, w_u, b_u, w_o, b_o)
    h2_refb = convgru_cell_ref_bf16(x, h1_refb, w_r, b_r, w_u, b_u, w_o, b_o)

    # Tight check vs matching-precision reference (catches indexing/layout bugs).
    assert jnp.allclose(h1, h1_refb, rtol=5e-3, atol=5e-3), "step-1 vs bf16 ref"
    assert jnp.allclose(h2, h2_refb, rtol=5e-3, atol=5e-3), "step-2 vs bf16 ref"
    # Loose check vs f32 HIGHEST reference (kernel MXU dots run at bf16).
    assert jnp.allclose(h1, h1_ref, rtol=2e-2, atol=2e-2), "step-1 vs f32 ref"
    assert jnp.allclose(h2, h2_ref, rtol=2e-2, atol=2e-2), "step-2 vs f32 ref"

    # Extra check exercising the batch-folded path (Bt > 1 images per dot).
    B2 = 8
    k1, k2 = jax.random.split(jax.random.PRNGKey(1))
    x8 = jax.random.normal(k1, (B2, Ci, H, W), dtype=jnp.float32)
    h8 = 0.5 * jax.random.normal(k2, (B2, Ch, H, W), dtype=jnp.float32)
    h8_new_rows = jax.block_until_ready(step(nchw_to_rows(x8), nchw_to_rows(h8)))
    h8_new = rows_to_nchw(h8_new_rows, Ch)
    h8_refb = convgru_cell_ref_bf16(x8, h8, w_r, b_r, w_u, b_u, w_o, b_o)
    h8_ref = convgru_cell_ref(x8, h8, w_r, b_r, w_u, b_u, w_o, b_o)
    assert jnp.allclose(h8_new, h8_refb, rtol=5e-3, atol=5e-3), "batched vs bf16 ref"
    assert jnp.allclose(h8_new, h8_ref, rtol=2e-2, atol=2e-2), "batched vs f32 ref"

    print("KERNEL_OK")
</pallas_src>

<mosaic_0001>
module attributes {stable_mosaic.version = 11 : i64} {
  func.func @kernel(%arg0: i32, %arg1: memref<1x26x192xf32, #tpu.memory_space<vmem>>, %arg2: memref<3x192x256xbf16, #tpu.memory_space<vmem>>, %arg3: memref<3x192x128xbf16, #tpu.memory_space<vmem>>, %arg4: memref<1x256xf32, #tpu.memory_space<vmem>>, %arg5: memref<1x128xf32, #tpu.memory_space<vmem>>, %arg6: memref<1x16x128xf32, #tpu.memory_space<vmem>>, %arg7: memref<24x256xf32, #tpu.memory_space<vmem>>) attributes {dimension_semantics = [#tpu.dimension_semantics<parallel>], iteration_bounds = array<i64: 2>, scalar_prefetch = 0 : i64, scratch_operands = 1 : i64, tpu.core_type = #tpu.core_type<tc>, window_params = [{transform_indices = @transform_0, window_bounds = array<i64: 1, 26, 192>}, {pipeline_mode = #tpu.pipeline_mode<synchronous>, transform_indices = @transform_1, window_bounds = array<i64: 3, 192, 256>}, {pipeline_mode = #tpu.pipeline_mode<synchronous>, transform_indices = @transform_2, window_bounds = array<i64: 3, 192, 128>}, {pipeline_mode = #tpu.pipeline_mode<synchronous>, transform_indices = @transform_3, window_bounds = array<i64: 1, 256>}, {pipeline_mode = #tpu.pipeline_mode<synchronous>, transform_indices = @transform_4, window_bounds = array<i64: 1, 128>}, {transform_indices = @transform_5, window_bounds = array<i64: 1, 16, 128>}]} {
    %c0 = arith.constant 0 : index
    %c0_0 = arith.constant 0 : index
    %c0_1 = arith.constant 0 : index
    %0 = vector.load %arg1[%c0, %c0_0, %c0_1] : memref<1x26x192xf32, #tpu.memory_space<vmem>>, vector<1x24x192xf32>
    %1 = vector.shape_cast %0 : vector<1x24x192xf32> to vector<24x192xf32>
    %2 = arith.truncf %1 : vector<24x192xf32> to vector<24x192xbf16>
    %c0_2 = arith.constant 0 : index
    %c0_3 = arith.constant 0 : index
    %c0_4 = arith.constant 0 : index
    %3 = vector.load %arg2[%c0_2, %c0_3, %c0_4] : memref<3x192x256xbf16, #tpu.memory_space<vmem>>, vector<1x192x256xbf16>
    %4 = vector.shape_cast %3 : vector<1x192x256xbf16> to vector<192x256xbf16>
    %cst = arith.constant dense<0.000000e+00> : vector<24x256xf32>
    %5 = tpu.matmul %2, %4, %cst {dimension_numbers = #tpu.dot_dimension_numbers<[1], [0], [0], [1], [0, 0, 1, 1], [], []>} : vector<24x192xbf16>, vector<192x256xbf16>, vector<24x256xf32> -> vector<24x256xf32>
    %c0_5 = arith.constant 0 : index
    %c1 = arith.constant 1 : index
    %c0_6 = arith.constant 0 : index
    %6 = vector.load %arg1[%c0_5, %c1, %c0_6] : memref<1x26x192xf32, #tpu.memory_space<vmem>>, vector<1x24x192xf32>
    %7 = vector.shape_cast %6 : vector<1x24x192xf32> to vector<24x192xf32>
    %8 = arith.truncf %7 : vector<24x192xf32> to vector<24x192xbf16>
    %c1_7 = arith.constant 1 : index
    %c0_8 = arith.constant 0 : index
    %c0_9 = arith.constant 0 : index
    %9 = vector.load %arg2[%c1_7, %c0_8, %c0_9] : memref<3x192x256xbf16, #tpu.memory_space<vmem>>, vector<1x192x256xbf16>
    %10 = vector.shape_cast %9 : vector<1x192x256xbf16> to vector<192x256xbf16>
    %cst_10 = arith.constant dense<0.000000e+00> : vector<24x256xf32>
    %11 = tpu.matmul %8, %10, %cst_10 {dimension_numbers = #tpu.dot_dimension_numbers<[1], [0], [0], [1], [0, 0, 1, 1], [], []>} : vector<24x192xbf16>, vector<192x256xbf16>, vector<24x256xf32> -> vector<24x256xf32>
    %12 = arith.addf %5, %11 : vector<24x256xf32>
    %c0_11 = arith.constant 0 : index
    %c2 = arith.constant 2 : index
    %c0_12 = arith.constant 0 : index
    %13 = vector.load %arg1[%c0_11, %c2, %c0_12] : memref<1x26x192xf32, #tpu.memory_space<vmem>>, vector<1x24x192xf32>
    %14 = vector.shape_cast %13 : vector<1x24x192xf32> to vector<24x192xf32>
    %15 = arith.truncf %14 : vector<24x192xf32> to vector<24x192xbf16>
    %c2_13 = arith.constant 2 : index
    %c0_14 = arith.constant 0 : index
    %c0_15 = arith.constant 0 : index
    %16 = vector.load %arg2[%c2_13, %c0_14, %c0_15] : memref<3x192x256xbf16, #tpu.memory_space<vmem>>, vector<1x192x256xbf16>
    %17 = vector.shape_cast %16 : vector<1x192x256xbf16> to vector<192x256xbf16>
    %cst_16 = arith.constant dense<0.000000e+00> : vector<24x256xf32>
    %18 = tpu.matmul %15, %17, %cst_16 {dimension_numbers = #tpu.dot_dimension_numbers<[1], [0], [0], [1], [0, 0, 1, 1], [], []>} : vector<24x192xbf16>, vector<192x256xbf16>, vector<24x256xf32> -> vector<24x256xf32>
    %19 = arith.addf %12, %18 : vector<24x256xf32>
    %c0_17 = arith.constant 0 : index
    %c0_18 = arith.constant 0 : index
    %20 = vector.load %arg4[%c0_17, %c0_18] : memref<1x256xf32, #tpu.memory_space<vmem>>, vector<1x256xf32>
    %21 = vector.broadcast %20 : vector<1x256xf32> to vector<24x256xf32>
    %22 = arith.addf %19, %21 : vector<24x256xf32>
    %23 = arith.negf %22 : vector<24x256xf32>
    %24 = math.exp %23 : vector<24x256xf32>
    %cst_19 = arith.constant 1.000000e+00 : f32
    %25 = vector.broadcast %cst_19 : f32 to vector<24x256xf32>
    %26 = arith.addf %25, %24 : vector<24x256xf32>
    %27 = arith.divf %25, %26 : vector<24x256xf32>
    %c0_20 = arith.constant 0 : index
    %c0_21 = arith.constant 0 : index
    %28 = vector.load %arg7[%c0_20, %c0_21] : memref<24x256xf32, #tpu.memory_space<vmem>>, vector<24x256xf32>
    tpu.vector_store %arg7[%c0_20, %c0_21], %27 {strides = array<i32>} : memref<24x256xf32, #tpu.memory_space<vmem>>, vector<24x256xf32>,
    %c0_22 = arith.constant 0 : index
    %c1_23 = arith.constant 1 : index
    %c0_24 = arith.constant 0 : index
    %29 = vector.load %arg1[%c0_22, %c1_23, %c0_24] : memref<1x26x192xf32, #tpu.memory_space<vmem>>, vector<1x16x128xf32>
    %30 = vector.shape_cast %29 : vector<1x16x128xf32> to vector<16x128xf32>
    %c0_25 = arith.constant 0 : index
    %c1_26 = arith.constant 1 : index
    %c128 = arith.constant 128 : index
    %31 = vector.load %arg1[%c0_25, %c1_26, %c128] : memref<1x26x192xf32, #tpu.memory_space<vmem>>, vector<1x16x64xf32>
    %32 = vector.shape_cast %31 : vector<1x16x64xf32> to vector<16x64xf32>
    %c0_27 = arith.constant 0 : index
    %c0_28 = arith.constant 0 : index
    %33 = vector.load %arg7[%c0_27, %c0_28] : memref<24x256xf32, #tpu.memory_space<vmem>>, vector<16x128xf32>
    %34 = arith.mulf %30, %33 : vector<16x128xf32>
    %35 = arith.truncf %34 : vector<16x128xf32> to vector<16x128xbf16>
    %36 = arith.truncf %32 : vector<16x64xf32> to vector<16x64xbf16>
    %37 = tpu.concatenate %35, %36 in 1 : vector<16x128xbf16>, vector<16x64xbf16> -> vector<16x192xbf16>
    %c0_29 = arith.constant 0 : index
    %c0_30 = arith.constant 0 : index
    %c0_31 = arith.constant 0 : index
    %38 = vector.load %arg3[%c0_29, %c0_30, %c0_31] : memref<3x192x128xbf16, #tpu.memory_space<vmem>>, vector<1x192x128xbf16>
    %39 = vector.shape_cast %38 : vector<1x192x128xbf16> to vector<192x128xbf16>
    %cst_32 = arith.constant dense<0.000000e+00> : vector<16x128xf32>
    %40 = tpu.matmul %37, %39, %cst_32 {dimension_numbers = #tpu.dot_dimension_numbers<[1], [0], [0], [1], [0, 0, 1, 1], [], []>} : vector<16x192xbf16>, vector<192x128xbf16>, vector<16x128xf32> -> vector<16x128xf32>
    %c0_33 = arith.constant 0 : index
    %c2_34 = arith.constant 2 : index
    %c0_35 = arith.constant 0 : index
    %41 = vector.load %arg1[%c0_33, %c2_34, %c0_35] : memref<1x26x192xf32, #tpu.memory_space<vmem>>, vector<1x16x128xf32>
    %42 = vector.shape_cast %41 : vector<1x16x128xf32> to vector<16x128xf32>
    %c0_36 = arith.constant 0 : index
    %c2_37 = arith.constant 2 : index
    %c128_38 = arith.constant 128 : index
    %43 = vector.load %arg1[%c0_36, %c2_37, %c128_38] : memref<1x26x192xf32, #tpu.memory_space<vmem>>, vector<1x16x64xf32>
    %44 = vector.shape_cast %43 : vector<1x16x64xf32> to vector<16x64xf32>
    %c1_39 = arith.constant 1 : index
    %c0_40 = arith.constant 0 : index
    %45 = vector.load %arg7[%c1_39, %c0_40] : memref<24x256xf32, #tpu.memory_space<vmem>>, vector<16x128xf32>
    %46 = arith.mulf %42, %45 : vector<16x128xf32>
    %47 = arith.truncf %46 : vector<16x128xf32> to vector<16x128xbf16>
    %48 = arith.truncf %44 : vector<16x64xf32> to vector<16x64xbf16>
    %49 = tpu.concatenate %47, %48 in 1 : vector<16x128xbf16>, vector<16x64xbf16> -> vector<16x192xbf16>
    %c1_41 = arith.constant 1 : index
    %c0_42 = arith.constant 0 : index
    %c0_43 = arith.constant 0 : index
    %50 = vector.load %arg3[%c1_41, %c0_42, %c0_43] : memref<3x192x128xbf16, #tpu.memory_space<vmem>>, vector<1x192x128xbf16>
    %51 = vector.shape_cast %50 : vector<1x192x128xbf16> to vector<192x128xbf16>
    %cst_44 = arith.constant dense<0.000000e+00> : vector<16x128xf32>
    %52 = tpu.matmul %49, %51, %cst_44 {dimension_numbers = #tpu.dot_dimension_numbers<[1], [0], [0], [1], [0, 0, 1, 1], [], []>} : vector<16x192xbf16>, vector<192x128xbf16>, vector<16x128xf32> -> vector<16x128xf32>
    %53 = arith.addf %40, %52 : vector<16x128xf32>
    %c0_45 = arith.constant 0 : index
    %c3 = arith.constant 3 : index
    %c0_46 = arith.constant 0 : index
    %54 = vector.load %arg1[%c0_45, %c3, %c0_46] : memref<1x26x192xf32, #tpu.memory_space<vmem>>, vector<1x16x128xf32>
    %55 = vector.shape_cast %54 : vector<1x16x128xf32> to vector<16x128xf32>
    %c0_47 = arith.constant 0 : index
    %c3_48 = arith.constant 3 : index
    %c128_49 = arith.constant 128 : index
    %56 = vector.load %arg1[%c0_47, %c3_48, %c128_49] : memref<1x26x192xf32, #tpu.memory_space<vmem>>, vector<1x16x64xf32>
    %57 = vector.shape_cast %56 : vector<1x16x64xf32> to vector<16x64xf32>
    %c2_50 = arith.constant 2 : index
    %c0_51 = arith.constant 0 : index
    %58 = vector.load %arg7[%c2_50, %c0_51] : memref<24x256xf32, #tpu.memory_space<vmem>>, vector<16x128xf32>
    %59 = arith.mulf %55, %58 : vector<16x128xf32>
    %60 = arith.truncf %59 : vector<16x128xf32> to vector<16x128xbf16>
    %61 = arith.truncf %57 : vector<16x64xf32> to vector<16x64xbf16>
    %62 = tpu.concatenate %60, %61 in 1 : vector<16x128xbf16>, vector<16x64xbf16> -> vector<16x192xbf16>
    %c2_52 = arith.constant 2 : index
    %c0_53 = arith.constant 0 : index
    %c0_54 = arith.constant 0 : index
    %63 = vector.load %arg3[%c2_52, %c0_53, %c0_54] : memref<3x192x128xbf16, #tpu.memory_space<vmem>>, vector<1x192x128xbf16>
    %64 = vector.shape_cast %63 : vector<1x192x128xbf16> to vector<192x128xbf16>
    %cst_55 = arith.constant dense<0.000000e+00> : vector<16x128xf32>
    %65 = tpu.matmul %62, %64, %cst_55 {dimension_numbers = #tpu.dot_dimension_numbers<[1], [0], [0], [1], [0, 0, 1, 1], [], []>} : vector<16x192xbf16>, vector<192x128xbf16>, vector<16x128xf32> -> vector<16x128xf32>
    %66 = arith.addf %53, %65 : vector<16x128xf32>
    %c0_56 = arith.constant 0 : index
    %c0_57 = arith.constant 0 : index
    %67 = vector.load %arg5[%c0_56, %c0_57] : memref<1x128xf32, #tpu.memory_space<vmem>>, vector<1x128xf32>
    %68 = vector.broadcast %67 : vector<1x128xf32> to vector<16x128xf32>
    %69 = arith.addf %66, %68 : vector<16x128xf32>
    %70 = math.tanh %69 : vector<16x128xf32>
    %c0_58 = arith.constant 0 : index
    %c2_59 = arith.constant 2 : index
    %c0_60 = arith.constant 0 : index
    %71 = vector.load %arg1[%c0_58, %c2_59, %c0_60] : memref<1x26x192xf32, #tpu.memory_space<vmem>>, vector<1x16x128xf32>
    %72 = vector.shape_cast %71 : vector<1x16x128xf32> to vector<16x128xf32>
    %c1_61 = arith.constant 1 : index
    %c128_62 = arith.constant 128 : index
    %73 = vector.load %arg7[%c1_61, %c128_62] : memref<24x256xf32, #tpu.memory_space<vmem>>, vector<16x128xf32>
    %cst_63 = arith.constant 1.000000e+00 : f32
    %74 = vector.broadcast %cst_63 : f32 to vector<16x128xf32>
    %75 = arith.subf %74, %73 : vector<16x128xf32>
    %76 = arith.mulf %72, %75 : vector<16x128xf32>
    %77 = arith.mulf %70, %73 : vector<16x128xf32>
    %78 = arith.addf %76, %77 : vector<16x128xf32>
    %c0_64 = arith.constant 0 : index
    %c0_65 = arith.constant 0 : index
    %c0_66 = arith.constant 0 : index
    %79 = vector.load %arg6[%c0_64, %c0_65, %c0_66] : memref<1x16x128xf32, #tpu.memory_space<vmem>>, vector<1x16x128xf32>
    %80 = vector.shape_cast %79 : vector<1x16x128xf32> to vector<16x128xf32>
    %81 = vector.shape_cast %78 : vector<16x128xf32> to vector<1x16x128xf32>
    tpu.vector_store %arg6[%c0_64, %c0_65, %c0_66], %81 {strides = array<i32>} : memref<1x16x128xf32, #tpu.memory_space<vmem>>, vector<1x16x128xf32>,
    return
  }
  func.func @transform_0(%arg0: i32) -> (i32, i32, i32) {
    %c0_i32 = arith.constant 0 : i32
    %c0_i32_0 = arith.constant 0 : i32
    %c0_i32_1 = arith.constant 0 : i32
    return %arg0, %c0_i32, %c0_i32_0 : i32, i32, i32
  }
  func.func @transform_1(%arg0: i32) -> (i32, i32, i32) {
    %c0_i32 = arith.constant 0 : i32
    %c0_i32_0 = arith.constant 0 : i32
    %c0_i32_1 = arith.constant 0 : i32
    %c0_i32_2 = arith.constant 0 : i32
    return %c0_i32, %c0_i32_0, %c0_i32_1 : i32, i32, i32
  }
  func.func @transform_2(%arg0: i32) -> (i32, i32, i32) {
    %c0_i32 = arith.constant 0 : i32
    %c0_i32_0 = arith.constant 0 : i32
    %c0_i32_1 = arith.constant 0 : i32
    %c0_i32_2 = arith.constant 0 : i32
    return %c0_i32, %c0_i32_0, %c0_i32_1 : i32, i32, i32
  }
  func.func @transform_3(%arg0: i32) -> (i32, i32) {
    %c0_i32 = arith.constant 0 : i32
    %c0_i32_0 = arith.constant 0 : i32
    %c0_i32_1 = arith.constant 0 : i32
    return %c0_i32, %c0_i32_0 : i32, i32
  }
  func.func @transform_4(%arg0: i32) -> (i32, i32) {
    %c0_i32 = arith.constant 0 : i32
    %c0_i32_0 = arith.constant 0 : i32
    %c0_i32_1 = arith.constant 0 : i32
    return %c0_i32, %c0_i32_0 : i32, i32
  }
  func.func @transform_5(%arg0: i32) -> (i32, i32, i32) {
    %c0_i32 = arith.constant 0 : i32
    %c0_i32_0 = arith.constant 0 : i32
    %c0_i32_1 = arith.constant 0 : i32
    return %arg0, %c0_i32, %c0_i32_0 : i32, i32, i32
  }
}

module attributes {stable_mosaic.version = 11 : i64} {
  func.func @kernel(%arg0: i32, %arg1: memref<1x26x192xf32, #tpu.memory_space<vmem>>, %arg2: memref<3x192x256xbf16, #tpu.memory_space<vmem>>, %arg3: memref<3x192x128xbf16, #tpu.memory_space<vmem>>, %arg4: memref<1x256xf32, #tpu.memory_space<vmem>>, %arg5: memref<1x128xf32, #tpu.memory_space<vmem>>, %arg6: memref<1x16x128xf32, #tpu.memory_space<vmem>>, %arg7: memref<24x256xf32, #tpu.memory_space<vmem>>) attributes {dimension_semantics = [#tpu.dimension_semantics<parallel>], iteration_bounds = array<i64: 2>, scalar_prefetch = 0 : i64, scratch_operands = 1 : i64, tpu.core_type = #tpu.core_type<tc>, window_params = [{transform_indices = @transform_0, window_bounds = array<i64: 1, 26, 192>}, {pipeline_mode = #tpu.pipeline_mode<synchronous>, transform_indices = @transform_1, window_bounds = array<i64: 3, 192, 256>}, {pipeline_mode = #tpu.pipeline_mode<synchronous>, transform_indices = @transform_2, window_bounds = array<i64: 3, 192, 128>}, {pipeline_mode = #tpu.pipeline_mode<synchronous>, transform_indices = @transform_3, window_bounds = array<i64: 1, 256>}, {pipeline_mode = #tpu.pipeline_mode<synchronous>, transform_indices = @transform_4, window_bounds = array<i64: 1, 128>}, {transform_indices = @transform_5, window_bounds = array<i64: 1, 16, 128>}]} {
    %c0 = arith.constant 0 : index
    %c0_0 = arith.constant 0 : index
    %c0_1 = arith.constant 0 : index
    %0 = vector.load %arg1[%c0, %c0_0, %c0_1] : memref<1x26x192xf32, #tpu.memory_space<vmem>>, vector<1x24x192xf32>
    %1 = vector.shape_cast %0 : vector<1x24x192xf32> to vector<24x192xf32>
    %2 = arith.truncf %1 : vector<24x192xf32> to vector<24x192xbf16>
    %c0_2 = arith.constant 0 : index
    %c0_3 = arith.constant 0 : index
    %c0_4 = arith.constant 0 : index
    %3 = vector.load %arg2[%c0_2, %c0_3, %c0_4] : memref<3x192x256xbf16, #tpu.memory_space<vmem>>, vector<1x192x256xbf16>
    %4 = vector.shape_cast %3 : vector<1x192x256xbf16> to vector<192x256xbf16>
    %cst = arith.constant dense<0.000000e+00> : vector<24x256xf32>
    %5 = tpu.matmul %2, %4, %cst {dimension_numbers = #tpu.dot_dimension_numbers<[1], [0], [0], [1], [0, 0, 1, 1], [], []>} : vector<24x192xbf16>, vector<192x256xbf16>, vector<24x256xf32> -> vector<24x256xf32>
    %c0_5 = arith.constant 0 : index
    %c1 = arith.constant 1 : index
    %c0_6 = arith.constant 0 : index
    %6 = vector.load %arg1[%c0_5, %c1, %c0_6] : memref<1x26x192xf32, #tpu.memory_space<vmem>>, vector<1x24x192xf32>
    %7 = vector.shape_cast %6 : vector<1x24x192xf32> to vector<24x192xf32>
    %8 = arith.truncf %7 : vector<24x192xf32> to vector<24x192xbf16>
    %c1_7 = arith.constant 1 : index
    %c0_8 = arith.constant 0 : index
    %c0_9 = arith.constant 0 : index
    %9 = vector.load %arg2[%c1_7, %c0_8, %c0_9] : memref<3x192x256xbf16, #tpu.memory_space<vmem>>, vector<1x192x256xbf16>
    %10 = vector.shape_cast %9 : vector<1x192x256xbf16> to vector<192x256xbf16>
    %cst_10 = arith.constant dense<0.000000e+00> : vector<24x256xf32>
    %11 = tpu.matmul %8, %10, %cst_10 {dimension_numbers = #tpu.dot_dimension_numbers<[1], [0], [0], [1], [0, 0, 1, 1], [], []>} : vector<24x192xbf16>, vector<192x256xbf16>, vector<24x256xf32> -> vector<24x256xf32>
    %12 = arith.addf %5, %11 : vector<24x256xf32>
    %c0_11 = arith.constant 0 : index
    %c2 = arith.constant 2 : index
    %c0_12 = arith.constant 0 : index
    %13 = vector.load %arg1[%c0_11, %c2, %c0_12] : memref<1x26x192xf32, #tpu.memory_space<vmem>>, vector<1x24x192xf32>
    %14 = vector.shape_cast %13 : vector<1x24x192xf32> to vector<24x192xf32>
    %15 = arith.truncf %14 : vector<24x192xf32> to vector<24x192xbf16>
    %c2_13 = arith.constant 2 : index
    %c0_14 = arith.constant 0 : index
    %c0_15 = arith.constant 0 : index
    %16 = vector.load %arg2[%c2_13, %c0_14, %c0_15] : memref<3x192x256xbf16, #tpu.memory_space<vmem>>, vector<1x192x256xbf16>
    %17 = vector.shape_cast %16 : vector<1x192x256xbf16> to vector<192x256xbf16>
    %cst_16 = arith.constant dense<0.000000e+00> : vector<24x256xf32>
    %18 = tpu.matmul %15, %17, %cst_16 {dimension_numbers = #tpu.dot_dimension_numbers<[1], [0], [0], [1], [0, 0, 1, 1], [], []>} : vector<24x192xbf16>, vector<192x256xbf16>, vector<24x256xf32> -> vector<24x256xf32>
    %19 = arith.addf %12, %18 : vector<24x256xf32>
    %c0_17 = arith.constant 0 : index
    %c0_18 = arith.constant 0 : index
    %20 = vector.load %arg4[%c0_17, %c0_18] : memref<1x256xf32, #tpu.memory_space<vmem>>, vector<1x256xf32>
    %21 = vector.broadcast %20 : vector<1x256xf32> to vector<24x256xf32>
    %22 = arith.addf %19, %21 : vector<24x256xf32>
    %23 = arith.negf %22 : vector<24x256xf32>
    %24 = math.exp %23 : vector<24x256xf32>
    %cst_19 = arith.constant 1.000000e+00 : f32
    %25 = vector.broadcast %cst_19 : f32 to vector<24x256xf32>
    %26 = arith.addf %25, %24 : vector<24x256xf32>
    %27 = arith.divf %25, %26 : vector<24x256xf32>
    %c0_20 = arith.constant 0 : index
    %c0_21 = arith.constant 0 : index
    %28 = vector.load %arg7[%c0_20, %c0_21] : memref<24x256xf32, #tpu.memory_space<vmem>>, vector<24x256xf32>
    tpu.vector_store %arg7[%c0_20, %c0_21], %27 {strides = array<i32>} : memref<24x256xf32, #tpu.memory_space<vmem>>, vector<24x256xf32>,
    %c0_22 = arith.constant 0 : index
    %c1_23 = arith.constant 1 : index
    %c0_24 = arith.constant 0 : index
    %29 = vector.load %arg1[%c0_22, %c1_23, %c0_24] : memref<1x26x192xf32, #tpu.memory_space<vmem>>, vector<1x16x128xf32>
    %30 = vector.shape_cast %29 : vector<1x16x128xf32> to vector<16x128xf32>
    %c0_25 = arith.constant 0 : index
    %c1_26 = arith.constant 1 : index
    %c128 = arith.constant 128 : index
    %31 = vector.load %arg1[%c0_25, %c1_26, %c128] : memref<1x26x192xf32, #tpu.memory_space<vmem>>, vector<1x16x64xf32>
    %32 = vector.shape_cast %31 : vector<1x16x64xf32> to vector<16x64xf32>
    %c0_27 = arith.constant 0 : index
    %c0_28 = arith.constant 0 : index
    %33 = vector.load %arg7[%c0_27, %c0_28] : memref<24x256xf32, #tpu.memory_space<vmem>>, vector<16x128xf32>
    %34 = arith.mulf %30, %33 : vector<16x128xf32>
    %35 = arith.truncf %34 : vector<16x128xf32> to vector<16x128xbf16>
    %36 = arith.truncf %32 : vector<16x64xf32> to vector<16x64xbf16>
    %37 = tpu.concatenate %35, %36 in 1 : vector<16x128xbf16>, vector<16x64xbf16> -> vector<16x192xbf16>
    %c0_29 = arith.constant 0 : index
    %c0_30 = arith.constant 0 : index
    %c0_31 = arith.constant 0 : index
    %38 = vector.load %arg3[%c0_29, %c0_30, %c0_31] : memref<3x192x128xbf16, #tpu.memory_space<vmem>>, vector<1x192x128xbf16>
    %39 = vector.shape_cast %38 : vector<1x192x128xbf16> to vector<192x128xbf16>
    %cst_32 = arith.constant dense<0.000000e+00> : vector<16x128xf32>
    %40 = tpu.matmul %37, %39, %cst_32 {dimension_numbers = #tpu.dot_dimension_numbers<[1], [0], [0], [1], [0, 0, 1, 1], [], []>} : vector<16x192xbf16>, vector<192x128xbf16>, vector<16x128xf32> -> vector<16x128xf32>
    %c0_33 = arith.constant 0 : index
    %c2_34 = arith.constant 2 : index
    %c0_35 = arith.constant 0 : index
    %41 = vector.load %arg1[%c0_33, %c2_34, %c0_35] : memref<1x26x192xf32, #tpu.memory_space<vmem>>, vector<1x16x128xf32>
    %42 = vector.shape_cast %41 : vector<1x16x128xf32> to vector<16x128xf32>
    %c0_36 = arith.constant 0 : index
    %c2_37 = arith.constant 2 : index
    %c128_38 = arith.constant 128 : index
    %43 = vector.load %arg1[%c0_36, %c2_37, %c128_38] : memref<1x26x192xf32, #tpu.memory_space<vmem>>, vector<1x16x64xf32>
    %44 = vector.shape_cast %43 : vector<1x16x64xf32> to vector<16x64xf32>
    %c1_39 = arith.constant 1 : index
    %c0_40 = arith.constant 0 : index
    %45 = vector.load %arg7[%c1_39, %c0_40] : memref<24x256xf32, #tpu.memory_space<vmem>>, vector<16x128xf32>
    %46 = arith.mulf %42, %45 : vector<16x128xf32>
    %47 = arith.truncf %46 : vector<16x128xf32> to vector<16x128xbf16>
    %48 = arith.truncf %44 : vector<16x64xf32> to vector<16x64xbf16>
    %49 = tpu.concatenate %47, %48 in 1 : vector<16x128xbf16>, vector<16x64xbf16> -> vector<16x192xbf16>
    %c1_41 = arith.constant 1 : index
    %c0_42 = arith.constant 0 : index
    %c0_43 = arith.constant 0 : index
    %50 = vector.load %arg3[%c1_41, %c0_42, %c0_43] : memref<3x192x128xbf16, #tpu.memory_space<vmem>>, vector<1x192x128xbf16>
    %51 = vector.shape_cast %50 : vector<1x192x128xbf16> to vector<192x128xbf16>
    %cst_44 = arith.constant dense<0.000000e+00> : vector<16x128xf32>
    %52 = tpu.matmul %49, %51, %cst_44 {dimension_numbers = #tpu.dot_dimension_numbers<[1], [0], [0], [1], [0, 0, 1, 1], [], []>} : vector<16x192xbf16>, vector<192x128xbf16>, vector<16x128xf32> -> vector<16x128xf32>
    %53 = arith.addf %40, %52 : vector<16x128xf32>
    %c0_45 = arith.constant 0 : index
    %c3 = arith.constant 3 : index
    %c0_46 = arith.constant 0 : index
    %54 = vector.load %arg1[%c0_45, %c3, %c0_46] : memref<1x26x192xf32, #tpu.memory_space<vmem>>, vector<1x16x128xf32>
    %55 = vector.shape_cast %54 : vector<1x16x128xf32> to vector<16x128xf32>
    %c0_47 = arith.constant 0 : index
    %c3_48 = arith.constant 3 : index
    %c128_49 = arith.constant 128 : index
    %56 = vector.load %arg1[%c0_47, %c3_48, %c128_49] : memref<1x26x192xf32, #tpu.memory_space<vmem>>, vector<1x16x64xf32>
    %57 = vector.shape_cast %56 : vector<1x16x64xf32> to vector<16x64xf32>
    %c2_50 = arith.constant 2 : index
    %c0_51 = arith.constant 0 : index
    %58 = vector.load %arg7[%c2_50, %c0_51] : memref<24x256xf32, #tpu.memory_space<vmem>>, vector<16x128xf32>
    %59 = arith.mulf %55, %58 : vector<16x128xf32>
    %60 = arith.truncf %59 : vector<16x128xf32> to vector<16x128xbf16>
    %61 = arith.truncf %57 : vector<16x64xf32> to vector<16x64xbf16>
    %62 = tpu.concatenate %60, %61 in 1 : vector<16x128xbf16>, vector<16x64xbf16> -> vector<16x192xbf16>
    %c2_52 = arith.constant 2 : index
    %c0_53 = arith.constant 0 : index
    %c0_54 = arith.constant 0 : index
    %63 = vector.load %arg3[%c2_52, %c0_53, %c0_54] : memref<3x192x128xbf16, #tpu.memory_space<vmem>>, vector<1x192x128xbf16>
    %64 = vector.shape_cast %63 : vector<1x192x128xbf16> to vector<192x128xbf16>
    %cst_55 = arith.constant dense<0.000000e+00> : vector<16x128xf32>
    %65 = tpu.matmul %62, %64, %cst_55 {dimension_numbers = #tpu.dot_dimension_numbers<[1], [0], [0], [1], [0, 0, 1, 1], [], []>} : vector<16x192xbf16>, vector<192x128xbf16>, vector<16x128xf32> -> vector<16x128xf32>
    %66 = arith.addf %53, %65 : vector<16x128xf32>
    %c0_56 = arith.constant 0 : index
    %c0_57 = arith.constant 0 : index
    %67 = vector.load %arg5[%c0_56, %c0_57] : memref<1x128xf32, #tpu.memory_space<vmem>>, vector<1x128xf32>
    %68 = vector.broadcast %67 : vector<1x128xf32> to vector<16x128xf32>
    %69 = arith.addf %66, %68 : vector<16x128xf32>
    %70 = math.tanh %69 : vector<16x128xf32>
    %c0_58 = arith.constant 0 : index
    %c2_59 = arith.constant 2 : index
    %c0_60 = arith.constant 0 : index
    %71 = vector.load %arg1[%c0_58, %c2_59, %c0_60] : memref<1x26x192xf32, #tpu.memory_space<vmem>>, vector<1x16x128xf32>
    %72 = vector.shape_cast %71 : vector<1x16x128xf32> to vector<16x128xf32>
    %c1_61 = arith.constant 1 : index
    %c128_62 = arith.constant 128 : index
    %73 = vector.load %arg7[%c1_61, %c128_62] : memref<24x256xf32, #tpu.memory_space<vmem>>, vector<16x128xf32>
    %cst_63 = arith.constant 1.000000e+00 : f32
    %74 = vector.broadcast %cst_63 : f32 to vector<16x128xf32>
    %75 = arith.subf %74, %73 : vector<16x128xf32>
    %76 = arith.mulf %72, %75 : vector<16x128xf32>
    %77 = arith.mulf %70, %73 : vector<16x128xf32>
    %78 = arith.addf %76, %77 : vector<16x128xf32>
    %c0_64 = arith.constant 0 : index
    %c0_65 = arith.constant 0 : index
    %c0_66 = arith.constant 0 : index
    %79 = vector.load %arg6[%c0_64, %c0_65, %c0_66] : memref<1x16x128xf32, #tpu.memory_space<vmem>>, vector<1x16x128xf32>
    %80 = vector.shape_cast %79 : vector<1x16x128xf32> to vector<16x128xf32>
    %81 = vector.shape_cast %78 : vector<16x128xf32> to vector<1x16x128xf32>
    tpu.vector_store %arg6[%c0_64, %c0_65, %c0_66], %81 {strides = array<i32>} : memref<1x16x128xf32, #tpu.memory_space<vmem>>, vector<1x16x128xf32>,
    return
  }
  func.func @transform_0(%arg0: i32) -> (i32, i32, i32) {
    %c0_i32 = arith.constant 0 : i32
    %c0_i32_0 = arith.constant 0 : i32
    %c0_i32_1 = arith.constant 0 : i32
    return %arg0, %c0_i32, %c0_i32_0 : i32, i32, i32
  }
  func.func @transform_1(%arg0: i32) -> (i32, i32, i32) {
    %c0_i32 = arith.constant 0 : i32
    %c0_i32_0 = arith.constant 0 : i32
    %c0_i32_1 = arith.constant 0 : i32
    %c0_i32_2 = arith.constant 0 : i32
    return %c0_i32, %c0_i32_0, %c0_i32_1 : i32, i32, i32
  }
  func.func @transform_2(%arg0: i32) -> (i32, i32, i32) {
    %c0_i32 = arith.constant 0 : i32
    %c0_i32_0 = arith.constant 0 : i32
    %c0_i32_1 = arith.constant 0 : i32
    %c0_i32_2 = arith.constant 0 : i32
    return %c0_i32, %c0_i32_0, %c0_i32_1 : i32, i32, i32
  }
  func.func @transform_3(%arg0: i32) -> (i32, i32) {
    %c0_i32 = arith.constant 0 : i32
    %c0_i32_0 = arith.constant 0 : i32
    %c0_i32_1 = arith.constant 0 : i32
    return %c0_i32, %c0_i32_0 : i32, i32
  }
  func.func @transform_4(%arg0: i32) -> (i32, i32) {
    %c0_i32 = arith.constant 0 : i32
    %c0_i32_0 = arith.constant 0 : i32
    %c0_i32_1 = arith.constant 0 : i32
    return %c0_i32, %c0_i32_0 : i32, i32
  }
  func.func @transform_5(%arg0: i32) -> (i32, i32, i32) {
    %c0_i32 = arith.constant 0 : i32
    %c0_i32_0 = arith.constant 0 : i32
    %c0_i32_1 = arith.constant 0 : i32
    return %arg0, %c0_i32, %c0_i32_0 : i32, i32, i32
  }
}

</mosaic_0001>

<bundles_post_ra>
// kernel: step.1
= control target key start
LH: loop header
LB: loop body
LE: loop exit
PB: predicated region body
PF: predicated region fallthrough
CT: control target
= control target key end

     0   :  { %10 = vsyncpa [#allocation4], 0  ;;  %s2567_s0 = inlined_call_operand.vmem [shape: f32[2,26,192], index: 0, kind: input, shape index: {}]   ;;  %s2568_s1 = inlined_call_operand.hbm [shape: bf16[3,192,256], index: 1, kind: input, shape index: {}]   ;;  %s2569_s2 = inlined_call_operand.hbm [shape: bf16[3,192,128], index: 2, kind: input, shape index: {}]   ;;  %s2570_s3 = inlined_call_operand.vmem [shape: f32[1,256], index: 3, kind: input, shape index: {}]   ;;  %s2571_s4 = inlined_call_operand.vmem [shape: f32[1,128], index: 4, kind: input, shape index: {}]   ;;  %s2572_s5 = inlined_call_operand.hbm [shape: f32[2,16,128], index: 5, kind: output, shape index: {}]  }
   0x1   :  { %11 = vsyncpa [#allocation7], 0 }
   0x2   :  { %12 = vsyncpa [#allocation5], 0 }
   0x3   :  { %14 = vsyncpa [#allocation5 + $0x1], 0  ;;  %s2263_s18 = smov 0   ;;  %s2265_s19 = smov 0  }
   0x4   :  { %s2267_s20 = smov 0   ;;  %s2269_s21 = smov 0  }
   0x5 LB: > { %s2284_s22 = sadd.s32 4294967295, %s2221_s21   ;;  %s1719_s23 = sadd.s32 4294967294, %s2221_s21   ;;  %s2221_s21 = sphi %s2269_s21, %s2586_s21   ;;  %s2217_s20 = sphi %s2267_s20, %s2585_s20   ;;  %s2213_s19 = sphi %s2265_s19, %s2584_s19   ;;  %s2209_s18 = sphi %s2263_s18, %s2583_s18  }
   0x6   : > { %s2288_s24 = sadd.s32 1, %s2221_s21   ;;  %s137_s25 = sadd.s32 1, %s2217_s20 }
   0x7   : > { %s134_s26 = ssub.s32 %s2221_s21, %s2288_s24  ;;  %p147_p0 = scmp.ne.s32.totalorder %s2217_s20, %s2213_s19 }
   0x8   : > { %p135_p1 = scmp.eq.s32.totalorder %s134_s26, 0  ;;  %p148_p2 = scmp.eq.s32.totalorder %s2284_s22, 1 }
   0x9   : > { %p153_p3 = scmp.ne.s32.totalorder %s2213_s19, %s2209_s18  ;;  %p154_p4 = scmp.eq.s32.totalorder %s1719_s23, 1 }
   0xa   : > { %s2299_s27 = scalar_select %p135_p1, %s2217_s20, %s137_s25  }
   0xb   : > { %p2301_p5 = por %p148_p2, %p147_p0  ;;  %p2305_p6 = por %p154_p4, %p153_p3 }
   0xc   : > { %p1720_p7 = scmp.ge.s32.totalorder %s2221_s21, 1  ;;  %p161_p8 = scmp.lt.s32.totalorder %s2221_s21, 3 }
   0xd   : > { %s2575_s29 = scalar_select %p2305_p6, 1, 0 }
   0xe   : > { %p2573_p9 = scmp.eq.s32.totalorder %s2284_s22, 0  ;;  %p2312_p10 = pnand %p1720_p7, %p161_p8 }
   0xf   : > { %s2223_s6 = smov [#allocation3]   ;;  %s2224_s9 = smov [#allocation6]  }
  0x10   : > { %s173_s7 = sshll.u32 %s2223_s6, 4  ;;  %p1871_p11 = pneg %p2312_p10  ;;  %s174_s7 = int_to_ptr.vmem [resolvable:$true] %s173_s7 }
  0x11   : > { %s186_s10 = sshll.u32 %s2224_s9, 4  ;;  %s2112_s11 = scalar_lea.vmem %s174_s7, 9216  ;;  %s187_s10 = int_to_ptr.vmem [resolvable:$true] %s186_s10 }
  0x12   : > { %p2320_p12 = pnand %p2573_p9, %p1871_p11  ;;  %p2113_p0 = scmp.ne.s32.totalorder %s174_s7, %s2112_s11 }
  0x13   : > { %p2120_p3 = scmp.lt.s32.totalorder %s174_s7, %s174_s7  ;;  %p2121_p4 = scmp.lt.s32.totalorder %s2112_s11, %s2112_s11 }
  0x14   : > { %p2103_p13 = pneg %p2320_p12 }
  0x15   : > { %p2122_p7 = por %p2121_p4, %p2120_p3 }
  0x16   : > { %p2115_p1 = pnand %p2113_p0, %p2103_p13 }
  0x18   : > { %p2116_p2 = pneg %p2115_p1 }
  0x1a   : > { %p2123_p8 = pnand %p2122_p7, %p2116_p2 }
  0x1c   : > { %2126 = shalt.err (!%p2123_p8)
}
  0x1d   : > { %s2225_s12 = smov 128   ;;  %s2226_s13 = smov 8  }
  0x1e   : > { %1874 = dma.hbm_to_vmem [thread:$0]  (!%p2320_p12), %s2568_s1, 9216, %s174_s7, [#allocation4], %s2225_s12, %s2225_s12, %s2226_s13  }
  0x1f   : > { %s2138_s16 = scalar_lea.vmem %s187_s10, 4608  ;;  %p2146_p9 = scmp.lt.s32.totalorder %s187_s10, %s187_s10 }
  0x20   : > { %p2139_p11 = scmp.ne.s32.totalorder %s187_s10, %s2138_s16  ;;  %p2147_p6 = scmp.lt.s32.totalorder %s2138_s16, %s2138_s16 }
  0x22   : > { %p2141_p0 = pnand %p2139_p11, %p2103_p13  ;;  %p2148_p3 = por %p2147_p6, %p2146_p9 }
  0x24   : > { %p2142_p1 = pneg %p2141_p0 }
  0x26   : > { %p2149_p2 = pnand %p2148_p3, %p2142_p1 }
  0x28   : > { %2152 = shalt.err (!%p2149_p2)
}
  0x29   : > { %s2227_s17 = smov 64   ;;  %s2228_s23 = smov 4  }
  0x2a   : > { %1877 = dma.hbm_to_vmem [thread:$0]  (!%p2320_p12), %s2569_s2, 4608, %s187_s10, [#allocation7], %s2227_s17, %s2227_s17, %s2228_s23  }
  0x2b   : > { %216 = sbr.rel (%p2312_p10) target bundleno = 688 (0x2b0), region = 40  ;;  %p2578_p4 = scmp.eq.s32.totalorder (!%p2312_p10), %s2284_s22, 0 }
  0x30   : > { %2196 = dma.done.wait (%p2578_p4), [#allocation4], 9216   ;;  %p2579_p13 = pmov %p2578_p4 }
  0x31   : > { %p2580_p6 = pmov %p2578_p4 }
  0x32   : > { %2198 = vsyncadd (%p2579_p13), [#allocation4], 4294958080 }
  0x33   : > { %2200 = dma.done.wait (%p2580_p6), [#allocation7], 4608   ;;  %p2581_p9 = pmov %p2578_p4 }
  0x34   : > { %v1928_v0 = vld [vmem:[#allocation3 + $0x134] ss:$8 sps:$4 sm:$0xff]   ;;  %v1932_v2 = vld [vmem:[#allocation3 + $0x130] ss:$8 sps:$4 sm:$0xff]   ;;  %v1934_v4 = vld [vmem:[#allocation3 + $0x124] ss:$8 sps:$4 sm:$0xff]  }
  0x35   : > { %2202 = vsyncadd (%p2581_p9), [#allocation7], 4294962688  ;;  %v1930_v1 = vld [vmem:[#allocation3 + $0x74] ss:$8 sps:$4 sm:$0xff]   ;;  %481 = vmatprep.subr.bf16.mxu0 %v1928_v0  ;;  %v1933_v3 = vld [vmem:[#allocation3 + $0x70] ss:$8 sps:$4 sm:$0xff]  }
  0x36   : > { %658 = vmatprep.subr.bf16.mxu1 %v1930_v1  ;;  %482 = vmatpush1.bf16.msra.mxu0 %v1932_v2  ;;  %v1936_v5 = vld [vmem:[#allocation3 + $0x64] ss:$8 sps:$4 sm:$0xff]   ;;  %v1938_v6 = vld [vmem:[#allocation3 + $0x120] ss:$8 sps:$4 sm:$0xff]   ;;  %v1940_v8 = vld [vmem:[#allocation3 + $0x114] ss:$8 sps:$4 sm:$0xff]  }
  0x37   : > { %659 = vmatpush1.bf16.msra.mxu1 %v1933_v3  ;;  %483 = vmatprep.subr.bf16.mxu0 %v1934_v4  ;;  %v1939_v7 = vld [vmem:[#allocation3 + $0x60] ss:$8 sps:$4 sm:$0xff]   ;;  %v1942_v9 = vld [vmem:[#allocation3 + $0x54] ss:$8 sps:$4 sm:$0xff]   ;;  %v1944_v10 = vld [vmem:[#allocation3 + $0x110] ss:$8 sps:$4 sm:$0xff]  }
  0x38   : > { %660 = vmatprep.subr.bf16.mxu1 %v1936_v5  ;;  %v1945_v11 = vld [vmem:[#allocation3 + $0x50] ss:$8 sps:$4 sm:$0xff]   ;;  %v1946_v12 = vld [vmem:[#allocation3 + $0x104] ss:$8 sps:$4 sm:$0xff]   ;;  %v1950_v14 = vld [vmem:[#allocation3 + $0x100] ss:$8 sps:$4 sm:$0xff]  }
  0x39   : > { %v1948_v13 = vld [vmem:[#allocation3 + $0x44] ss:$8 sps:$4 sm:$0xff]   ;;  %v1951_v15 = vld [vmem:[#allocation3 + $0x40] ss:$8 sps:$4 sm:$0xff]   ;;  %v1952_v16 = vld [vmem:[#allocation3 + $0xf4] ss:$8 sps:$4 sm:$0xff]  }
  0x3a   : > { %484 = vmatpush1.bf16.msra.mxu0 %v1938_v6  ;;  %v1954_v17 = vld [vmem:[#allocation3 + $0x34] ss:$8 sps:$4 sm:$0xff]   ;;  %v1956_v18 = vld [vmem:[#allocation3 + $0xf0] ss:$8 sps:$4 sm:$0xff]   ;;  %v1958_v20 = vld [vmem:[#allocation3 + $0xe4] ss:$8 sps:$4 sm:$0xff]  }
  0x3b   : > { %661 = vmatpush1.bf16.msra.mxu1 %v1939_v7  ;;  %485 = vmatprep.subr.bf16.mxu0 %v1940_v8  ;;  %v1957_v19 = vld [vmem:[#allocation3 + $0x30] ss:$8 sps:$4 sm:$0xff]   ;;  %v1960_v21 = vld [vmem:[#allocation3 + $0x24] ss:$8 sps:$4 sm:$0xff]   ;;  %p248_p10 = scmp.lt.s32.totalorder %s2284_s22, 1  ;;  %vm474_vm0 = vcmask 523264  }
  0x3c   : > { %662 = vmatprep.subr.bf16.mxu1 %v1942_v9  ;;  %v1962_v22 = vld [vmem:[#allocation3 + $0xe0] ss:$8 sps:$4 sm:$0xff]   ;;  %v1964_v24 = vld [vmem:[#allocation3 + $0xd4] ss:$8 sps:$4 sm:$0xff]   ;;  %v1968_v26 = vld [vmem:[#allocation3 + $0xd0] ss:$8 sps:$4 sm:$0xff]  }
  0x3d   : > { %v1963_v23 = vld [vmem:[#allocation3 + $0x20] ss:$8 sps:$4 sm:$0xff]   ;;  %v1966_v25 = vld [vmem:[#allocation3 + $0x14] ss:$8 sps:$4 sm:$0xff]   ;;  %s249_s30 = scalar_select %p248_p10, %s2284_s22, 1  ;;  %vm746_vm2 = vcmask 1046528  }
  0x3e   : > { %486 = vmatpush1.bf16.msra.mxu0 %v1944_v10  ;;  %v1969_v27 = vld [vmem:[#allocation3 + $0x10] ss:$8 sps:$4 sm:$0xff]   ;;  %v1970_v28 = vld [vmem:[#allocation3 + $0xc4] ss:$8 sps:$4 sm:$0xff]   ;;  %v1974_v30 = vld [vmem:[#allocation3 + $0xc0] ss:$8 sps:$4 sm:$0xff]  }
  0x3f   : > { %663 = vmatpush1.bf16.msra.mxu1 %v1945_v11  ;;  %487 = vmatprep.subr.bf16.mxu0 %v1946_v12  ;;  %v1972_v29 = vld [vmem:[#allocation3 + $0x4] ss:$8 sps:$4 sm:$0xff]   ;;  %s1859_s6 = sshll.u32 %s249_s30, 6  ;;  %v1975_v31 = vld [vmem:[#allocation3] ss:$8 sps:$4 sm:$0xff]   ;;  %vm1008_vm3 = vcmask 1040384  }
  0x40   : > { %664 = vmatprep.subr.bf16.mxu1 %v1948_v13  ;;  %v1976_v32 = vld [vmem:[#allocation3 + $0x174] ss:$8 sps:$4 sm:$0xff]   ;;  %s2357_s9 = scalar_lea.vmem %s2567_s0, %s1859_s6  ;;  %v1980_v34 = vld [vmem:[#allocation3 + $0x170] ss:$8 sps:$4 sm:$0xff]   ;;  %v1982_v36 = vld [vmem:[#allocation3 + $0x164] ss:$8 sps:$4 sm:$0xff]  }
  0x41   : > { %v1978_v33 = vld [vmem:[#allocation3 + $0xb4] ss:$8 sps:$4 sm:$0xff]   ;;  %v1981_v35 = vld [vmem:[#allocation3 + $0xb0] ss:$8 sps:$4 sm:$0xff]   ;;  %v1984_v37 = vld [vmem:[#allocation3 + $0xa4] ss:$8 sps:$4 sm:$0xff]  }
  0x42   : > { %488 = vmatpush1.bf16.msra.mxu0 %v1950_v14  ;;  %v2360_v38 = vld [vmem:[%s2357_s9 + $0x18] sm:$0xff]  ;;  %v2363_v39 = vld [vmem:[%s2357_s9 + $0x28] sm:$0xff]  ;;  %v2370_v44 = vld [vmem:[%s2357_s9 + $0x10] sm:$0xff]  ;;  %vm321_vm1 = vsmask.f32 7424  ;;  %s245_s14 = sand.u32 1, %s2213_s19  }
  0x43   : > { %665 = vmatpush1.bf16.msra.mxu1 %v1951_v15  ;;  %489 = vmatprep.subr.bf16.mxu0 %v1952_v16  ;;  %v289_v40 = vld [vmem:[%s2357_s9 + $0x8] sm:$0xfe]  ;;  %v291_v41 = vld [vmem:[%s2357_s9 + $0x38] sm:$0x1]  ;;  %v2375_v47 = vld [vmem:[%s2357_s9 + $0x20] sm:$0xff]  ;;  %s1727_s15 = sshll.u32 %s245_s14, 4 }
  0x44   : > { %666 = vmatprep.subr.bf16.mxu1 %v1954_v17  ;;  %v293_v42 = vpack.c.bf16 %v2360_v38, %v289_v40  ;;  %v255_v43 = vld [vmem:[%s2357_s9 + $0x8] sm:$0xff]  ;;  %v295_v45 = vpack.c.bf16 %v291_v41, %v2363_v39  ;;  %v288_v48 = vld [vmem:[%s2357_s9] sm:$0xfe]  ;;  %v290_v49 = vld [vmem:[%s2357_s9 + $0x30] sm:$0x1]  ;;  %vm1608_vm5 = vcmask 1041408  }
  0x45   : > { %v261_v46 = vpack.c.bf16 %v2360_v38, %v255_v43  ;;  %v1986_v50 = vld [vmem:[#allocation3 + $0x160] ss:$8 sps:$4 sm:$0xff]   ;;  %v292_v53 = vpack.c.bf16 %v2370_v44, %v288_v48  ;;  %v1988_v55 = vld [vmem:[#allocation3 + $0x154] ss:$8 sps:$4 sm:$0xff]   ;;  %v294_v57 = vpack.c.bf16 %v290_v49, %v2375_v47  ;;  %v1992_v61 = vld [vmem:[#allocation3 + $0x150] ss:$8 sps:$4 sm:$0xff]  }
  0x46   : > { %490 = vmatpush1.bf16.msra.mxu0 %v1956_v18  ;;  %v335_v51 = vshrl.u32 %v293_v42, 16  ;;  %v337_v52 = vshll.u32 %v293_v42, 16  ;;  %v1987_v54 = vld [vmem:[#allocation3 + $0xa0] ss:$8 sps:$4 sm:$0xff]   ;;  %v342_v56 = vshll.u32 %v295_v45, 16  ;;  %v349_v9 = vshrl.u32 %v295_v45, 16 }
  0x47   : > { %667 = vmatpush1.bf16.msra.mxu1 %v1957_v19  ;;  %491 = vmatprep.subr.bf16.mxu0 %v1958_v20  ;;  %v1990_v58 = vld [vmem:[#allocation3 + $0x94] ss:$8 sps:$4 sm:$0xff]   ;;  %v325_v60 = vshll.u32 %v292_v53, 16  ;;  %v1993_v63 = vld [vmem:[#allocation3 + $0x90] ss:$8 sps:$4 sm:$0xff]   ;;  %v323_v2 = vshrl.u32 %v292_v53, 16  ;;  %v263_v19 = vpack.c.bf16 %v2363_v39, %v2363_v39 }
  0x48   : > { %668 = vmatprep.subr.bf16.mxu1 %v1960_v21  ;;  %v339_v59 = vrot.slane %v337_v52, 1  ;;  %v344_v62 = vrot.slane %v342_v56, 1  ;;  %1780 = vmatprep.mubr.msk.bf16.mxu1 %vm474_vm0, %v261_v46  ;;  %v1994_v1 = vld [vmem:[#allocation3 + $0x144] ss:$8 sps:$4 sm:$0xff]   ;;  %v330_v4 = vshll.u32 %v294_v57, 16  ;;  %v254_v12 = vld [vmem:[%s2357_s9] sm:$0xff] }
  0x49   : > { %v327_v3 = vrot.slane %v325_v60, 1  ;;  %v1996_v5 = vld [vmem:[#allocation3 + $0x84] ss:$8 sps:$4 sm:$0xff]   ;;  %v1998_v7 = vld [vmem:[#allocation3 + $0x140] ss:$8 sps:$4 sm:$0xff]   ;;  %v260_v14 = vpack.c.bf16 %v2370_v44, %v254_v12  ;;  %v346_v20 = vshrl.u32 %v294_v57, 16 }
  0x4a   : > { %492 = vmatpush1.bf16.msra.mxu0 %v1962_v22  ;;  %v340_v0 = vor.u32 %v339_v59, %v335_v51  ;;  %v1999_v8 = vld [vmem:[#allocation3 + $0x80] ss:$8 sps:$4 sm:$0xff]   ;;  %v332_v11 = vrot.slane %v330_v4, 1  ;;  %v2002_v13 = vld [vmem:[#allocation3 + $0x1f4] ss:$8 sps:$4 sm:$0xff]   ;;  %v351_v15 = vor.u32 %v349_v9, %v344_v62  ;;  %s1860_s16 = sshll.u32 %s2284_s22, 8 }
  0x4b   : > { %669 = vmatpush1.bf16.msra.mxu1 %v1963_v23  ;;  %493 = vmatprep.subr.bf16.mxu0 %v1964_v24  ;;  %v328_v10 = vor.u32 %v327_v3, %v323_v2  ;;  %v2000_v17 = vld [vmem:[#allocation3 + $0x1f0] ss:$8 sps:$4 sm:$0xff]   ;;  %v2005_v18 = vld [vmem:[#allocation3 + $0x1e4] ss:$8 sps:$4 sm:$0xff]   ;;  %v2003_v21 = vld [vmem:[#allocation3 + $0x1e0] ss:$8 sps:$4 sm:$0xff]   ;;  %s2523_s30 = scalar_lea.hbm %s2572_s5, %s1860_s16 }
  0x4c   : > { %670 = vmatprep.subr.bf16.mxu1 %v1966_v25  ;;  %v345_v6 = vsel %vm321_vm1, %v340_v0, %v344_v62  ;;  %v710_v22 = vld [vmem:[%s2357_s9 + $0x8] sm:$0xfc]  ;;  %v712_v23 = vld [vmem:[%s2357_s9 + $0x38] sm:$0x3]  ;;  %v2023_v42 = vld [vmem:[#allocation3 + $0x184] ss:$8 sps:$4 sm:$0xff]  }
  0x4d   : > { %1754 = vmatprep.mubr.msk.bf16.mxu0 %vm474_vm0, %v345_v6  ;;  %v333_v16 = vsel %vm321_vm1, %v328_v10, %v332_v11  ;;  %v2008_v24 = vld [vmem:[#allocation3 + $0x1d4] ss:$8 sps:$4 sm:$0xff]   ;;  %v714_v25 = vpack.c.bf16 %v2360_v38, %v710_v22  ;;  %v2018_v41 = vld [vmem:[#allocation3 + $0x190] ss:$8 sps:$4 sm:$0xff]   ;;  %v2021_v43 = vld [vmem:[#allocation3 + $0x180] ss:$8 sps:$4 sm:$0xff]  }
  0x4e   : > { %494 = vmatpush1.bf16.msra.mxu0 %v1968_v26  ;;  %v716_v26 = vpack.c.bf16 %v712_v23, %v2363_v39  ;;  %v2015_v39 = vld [vmem:[#allocation3 + $0x1a0] ss:$8 sps:$4 sm:$0xff]   ;;  %v2020_v40 = vld [vmem:[#allocation3 + $0x194] ss:$8 sps:$4 sm:$0xff]   ;;  %v2024_v46 = vld [vmem:[#allocation3 + $0x230] ss:$8 sps:$4 sm:$0xff]  }
  0x4f   : > { %671 = vmatpush1.bf16.msra.mxu1 %v1969_v27  ;;  %495 = vmatprep.subr.bf16.mxu0 %v1970_v28  ;;  %v2006_v27 = vld [vmem:[#allocation3 + $0x1d0] ss:$8 sps:$4 sm:$0xff]   ;;  %v348_v28 = vor.u32 %v346_v20, %v332_v11  ;;  %v2026_v45 = vld [vmem:[#allocation3 + $0x234] ss:$8 sps:$4 sm:$0xff]   ;;  %v2029_v48 = vld [vmem:[#allocation3 + $0x224] ss:$8 sps:$4 sm:$0xff]  }
  0x50   : > { %672 = vmatprep.subr.bf16.mxu1 %v1972_v29  ;;  %v262_v29 = vpack.c.bf16 %v2375_v47, %v2375_v47  ;;  %v2027_v49 = vld [vmem:[#allocation3 + $0x220] ss:$8 sps:$4 sm:$0xff]   ;;  %v709_v51 = vld [vmem:[%s2357_s9] sm:$0xfc]  ;;  %v2035_v56 = vld [vmem:[#allocation3 + $0x204] ss:$8 sps:$4 sm:$0xff]  }
  0x51   : > { %v711_v52 = vld [vmem:[%s2357_s9 + $0x30] sm:$0x3]  ;;  %v2030_v53 = vld [vmem:[#allocation3 + $0x210] ss:$8 sps:$4 sm:$0xff]   ;;  %v2229_v62 = vmov 0   ;;  %v2041_v0 = vld [vmem:[#allocation6 + $0x28] sm:$0xff]  }
  0x52   : > { %496 = vmatpush1.bf16.msra.mxu0 %v1974_v30  ;;  %v750_v30 = vrot.slane %v714_v25, 1  ;;  %v2033_v57 = vld [vmem:[#allocation3 + $0x200] ss:$8 sps:$4 sm:$0xff]   ;;  %v2045_v4 = vld [vmem:[#allocation6 + $0x18] sm:$0xff]   ;;  %v2047_v6 = vld [vmem:[#allocation6 + $0x10] sm:$0xff]   ;;  %s247_s17 = scalar_lea.vmem [#allocation8], %s1727_s15 }
  0x53   : > { %673 = vmatpush1.bf16.msra.mxu1 %v1975_v31  ;;  %505 = vmatprep.subr.bf16.mxu0 %v1976_v32  ;;  %v751_v31 = vrot.slane %v716_v26, 1  ;;  %v2011_v32 = vld [vmem:[#allocation3 + $0x1c4] ss:$8 sps:$4 sm:$0xff]   ;;  %v2046_v9 = vld [vmem:[#allocation6 + $0x70] sm:$0xff]   ;;  %v2053_v12 = vld [vmem:[#allocation6 + $0x58] sm:$0xff]   ;;  %s1635_s23 = sshll.u32 %s247_s17, 4  ;;  %s2525_s23 = int_to_ptr.vmem [resolvable:$true] %s1635_s23 }
  0x54   : > { %682 = vmatprep.subr.bf16.mxu1 %v1978_v33  ;;  %v2043_v2 = vld [vmem:[#allocation6 + $0x20] sm:$0xff]   ;;  %v2040_v3 = vld [vmem:[#allocation6 + $0x88] sm:$0xff]   ;;  %v2054_v20 = vld [vmem:[#allocation6 + $0xb0] sm:$0xff]   ;;  %vm1408_vm4 = vsmask.f32 6400  ;;  %s2527_s22 = scalar_lea.sflag [#allocation5], %s245_s14 }
  0x55   : > { %v752_v33 = vsel %vm746_vm2, %v750_v30, %v751_v31  ;;  %v2051_v10 = vld [vmem:[#allocation6] sm:$0xff]   ;;  %v2048_v11 = vld [vmem:[#allocation6 + $0x68] sm:$0xff]   ;;  %v1048_v25 = vld [vmem:[%s2357_s9 + $0x8] sm:$0xfc]  ;;  %s2153_s6 = scalar_lea.vmem %s2525_s23, 256  ;;  %s2230_s7 = smov [#allocation8]  }
  0x56   : > { %506 = vmatpush2.bf16.msra.mxu0 %v1980_v34  ;;  %v2009_v34 = vld [vmem:[#allocation3 + $0x1c0] ss:$8 sps:$4 sm:$0xff]   ;;  %v1049_v26 = vld [vmem:[%s2357_s9 + $0x28] sm:$0x3]  ;;  %p2154_p12 = scmp.ne.s32.totalorder %s2525_s23, %s2153_s6  ;;  %s2157_s8 = sshll.u32 %s2230_s7, 4  ;;  %s2158_s8 = int_to_ptr.vmem [resolvable:$false] %s2157_s8 }
  0x57   : > { %683 = vmatpush2.bf16.msra.mxu1 %v1981_v35  ;;  %507 = vmatprep.subr.bf16.mxu0 %v1982_v36  ;;  %v2014_v35 = vld [vmem:[#allocation3 + $0x1b4] ss:$8 sps:$4 sm:$0xff]   ;;  %v2012_v36 = vld [vmem:[#allocation3 + $0x1b0] ss:$8 sps:$4 sm:$0xff]   ;;  %p2160_p11 = scmp.lt.s32.totalorder %s2525_s23, %s2158_s8 }
  0x58   : > { %684 = vmatprep.subr.bf16.mxu1 %v1984_v37  ;;  %v2017_v37 = vld [vmem:[#allocation3 + $0x1a4] ss:$8 sps:$4 sm:$0xff]   ;;  %p2155_p7 = pnand %p2154_p12, %p2301_p5 }
  0x5a   : > { %508 = vmatpush2.bf16.msra.mxu0 %v1986_v50  ;;  %v2032_v50 = vld [vmem:[#allocation3 + $0x214] ss:$8 sps:$4 sm:$0xff]   ;;  %p2156_p8 = pneg %p2155_p7 }
  0x5b   : > { %685 = vmatpush2.bf16.msra.mxu1 %v1987_v54  ;;  %509 = vmatprep.subr.bf16.mxu0 %v1988_v55  ;;  %v713_v54 = vpack.c.bf16 %v2370_v44, %v709_v51  ;;  %v715_v55 = vpack.c.bf16 %v711_v52, %v2375_v47  ;;  %v2039_v47 = vld [vmem:[#allocation6 + $0x30] sm:$0xff]  }
  0x5c   : > { %686 = vmatprep.subr.bf16.mxu1 %v1990_v58 }
  0x5d   : > { %v747_v58 = vrot.slane %v713_v54, 1  ;;  %v748_v59 = vrot.slane %v715_v55, 1 }
  0x5e   : > { %510 = vmatpush2.bf16.msra.mxu0 %v1992_v61  ;;  %v2037_v61 = vld [vmem:[#allocation6 + $0x38] sm:$0xff]  }
  0x5f   : > { %687 = vmatpush2.bf16.msra.mxu1 %v1993_v63  ;;  %511 = vmatprep.subr.bf16.mxu0 %v1994_v1  ;;  %v749_v60 = vsel %vm746_vm2, %v747_v58, %v748_v59  ;;  %v2036_v63 = vld [vmem:[#allocation6 + $0x98] sm:$0xff]   ;;  %v2038_v1 = vld [vmem:[#allocation6 + $0x90] sm:$0xff]   ;;  %v940_v58 = vlaneseq }
  0x60   : > { %688 = vmatprep.subr.bf16.mxu1 %v1996_v5  ;;  %v2042_v5 = vld [vmem:[#allocation6 + $0x80] sm:$0xff]  }
  0x62   : > { %512 = vmatpush2.bf16.msra.mxu0 %v1998_v7  ;;  %v2044_v7 = vld [vmem:[#allocation6 + $0x78] sm:$0xff]  }
  0x63   : > { %689 = vmatpush2.bf16.msra.mxu1 %v1999_v8  ;;  %881 = vmatprep.subr.bf16.mxu0 %v2002_v13  ;;  %v2049_v8 = vld [vmem:[#allocation6 + $0x8] sm:$0xff]   ;;  %v2050_v13 = vld [vmem:[#allocation6 + $0x60] sm:$0xff]  }
  0x64   : > { %1179 = vmatprep.subr.bf16.mxu1 %v2229_v62 }
  0x65   : > { %514 = vmatmul.mubr.bf16.vlgmr.msra.gmra.mxu0 %v333_v16  ;;  %v2052_v16 = vld [vmem:[#allocation6 + $0xb8] sm:$0xff]  }
  0x66   : > { %691 = vmatmul.mubr.bf16.vlgmr.msra.gmra.mxu1 %v260_v14  ;;  %882 = vmatpush1.bf16.msra.mxu0 %v2000_v17  ;;  %v2055_v14 = vld [vmem:[#allocation6 + $0x50] sm:$0xff]  }
  0x67   : > { %1755 = vmatprep.mubr.msk.bf16.mxu0 %vm474_vm0, %v351_v15  ;;  %883 = vmatprep.subr.bf16.mxu0 %v2005_v18  ;;  %v1001_v15 = vld [vmem:[%s2357_s9 + $0x8] sm:$0xfe]  ;;  %v2057_v18 = vld [vmem:[#allocation6 + $0x48] sm:$0xff]  }
  0x68   : > { %1781 = vmatprep.mubr.msk.bf16.mxu1 %vm474_vm0, %v263_v19  ;;  %1180 = vmatpush1.bf16.msra.mxu1 %v2036_v63  ;;  %v1020_v17 = vpack.c.bf16 %v2360_v38, %v1001_v15  ;;  %v1003_v19 = vld [vmem:[%s2357_s9 + $0x28] sm:$0x1] }
  0x69   : > { %1181 = vmatprep.subr.bf16.mxu1 %v2229_v62 }
  0x6a   : > { %884 = vmatpush1.bf16.msra.mxu0 %v2003_v21  ;;  %v1021_v21 = vpack.c.bf16 %v1003_v19, %v1003_v19  ;;  %v1233_v22 = vshrl.u32 %v1020_v17, 16  ;;  %v1235_v23 = vshll.u32 %v1020_v17, 16 }
  0x6b   : > { %885 = vmatprep.subr.bf16.mxu0 %v2008_v24  ;;  %v2059_v24 = vld [vmem:[#allocation6 + $0x40] sm:$0xff]  }
  0x6c   : > { %1182 = vmatpush1.bf16.msra.mxu1 %v2038_v1  ;;  %v1240_v30 = vshll.u32 %v1021_v21, 16 }
  0x6d   : > { %524 = vmatmul.mubr.bf16.gmra.mxu0 %v348_v28  ;;  %1183 = vmatprep.subr.bf16.mxu1 %v2229_v62  ;;  %v1067_v28 = vpack.c.bf16 %v1049_v26, %v1049_v26 }
  0x6e   : > { %701 = vmatmul.mubr.bf16.gmra.mxu1 %v262_v29  ;;  %886 = vmatpush1.bf16.msra.mxu0 %v2006_v27  ;;  %v1066_v27 = vpack.c.bf16 %v2360_v38, %v1048_v25  ;;  %v1237_v29 = vrot.slane %v1235_v23, 1 }
  0x6f   : > { %1806 = vmatprep.mubr.msk.bf16.mxu0 %vm474_vm0, %v752_v33  ;;  %887 = vmatprep.subr.bf16.mxu0 %v2011_v32  ;;  %v1101_v33 = vrot.slane %v1067_v28, 1 }
  0x70   : > { %1184 = vmatpush1.bf16.msra.mxu1 %v2040_v3  ;;  %v1100_v32 = vrot.slane %v1066_v27, 1 }
  0x71   : > { %1185 = vmatprep.subr.bf16.mxu1 %v2229_v62 }
  0x72   : > { %888 = vmatpush1.bf16.msra.mxu0 %v2009_v34  ;;  %v1238_v34 = vor.u32 %v1237_v29, %v1233_v22 }
  0x73   : > { %889 = vmatprep.subr.bf16.mxu0 %v2014_v35  ;;  %v1242_v35 = vrot.slane %v1240_v30, 1 }
  0x74   : > { %1186 = vmatpush1.bf16.msra.mxu1 %v2042_v5 }
  0x75   : > { %1187 = vmatprep.subr.bf16.mxu1 %v2229_v62 }
  0x76   : > { %890 = vmatpush1.bf16.msra.mxu0 %v2012_v36  ;;  %v1102_v36 = vsel %vm746_vm2, %v1100_v32, %v1101_v33 }
  0x77   : > { %891 = vmatprep.subr.bf16.mxu0 %v2017_v37  ;;  %v1243_v37 = vsel %vm321_vm1, %v1238_v34, %v1242_v35  ;;  %1826 = vmatprep.mubr.msk.bf16.mxu1 %vm474_vm0, %v1102_v36 }
  0x78   : > { %1188 = vmatpush1.bf16.msra.mxu1 %v2044_v7 }
  0x79   : > { %1189 = vmatprep.subr.bf16.mxu1 %v2229_v62 }
  0x7a   : > { %892 = vmatpush1.bf16.msra.mxu0 %v2015_v39  ;;  %v2058_v39 = vld [vmem:[#allocation6 + $0xa0] sm:$0xff]  }
  0x7b   : > { %893 = vmatprep.subr.bf16.mxu0 %v2020_v40 }
  0x7c   : > { %1190 = vmatpush1.bf16.msra.mxu1 %v2046_v9 }
  0x7d   : > { %1191 = vmatprep.subr.bf16.mxu1 %v2229_v62 }
  0x7e   : > { %894 = vmatpush1.bf16.msra.mxu0 %v2018_v41 }
  0x7f   : > { %895 = vmatprep.subr.bf16.mxu0 %v2023_v42 }
  0x80   : > { %1192 = vmatpush1.bf16.msra.mxu1 %v2048_v11 }
  0x81   : > { %1193 = vmatprep.subr.bf16.mxu1 %v2229_v62 }
  0x82   : > { %896 = vmatpush1.bf16.msra.mxu0 %v2021_v43 }
  0x83   : > { %905 = vmatprep.subr.bf16.mxu0 %v2026_v45 }
  0x84   : > { %1194 = vmatpush1.bf16.msra.mxu1 %v2050_v13 }
  0x85   : > { %1203 = vmatprep.subr.bf16.mxu1 %v2229_v62 }
  0x86   : > { %906 = vmatpush2.bf16.msra.mxu0 %v2024_v46 }
  0x87   : > { %907 = vmatprep.subr.bf16.mxu0 %v2029_v48 }
  0x88   : > { %1204 = vmatpush2.bf16.msra.mxu1 %v2052_v16 }
  0x89   : > { %1205 = vmatprep.subr.bf16.mxu1 %v2229_v62 }
  0x8a   : > { %908 = vmatpush2.bf16.msra.mxu0 %v2027_v49 }
  0x8b   : > { %909 = vmatprep.subr.bf16.mxu0 %v2032_v50 }
  0x8c   : > { %1206 = vmatpush2.bf16.msra.mxu1 %v2054_v20 }
  0x8d   : > { %1207 = vmatprep.subr.bf16.mxu1 %v2229_v62 }
  0x8e   : > { %910 = vmatpush2.bf16.msra.mxu0 %v2030_v53 }
  0x8f   : > { %911 = vmatprep.subr.bf16.mxu0 %v2035_v56 }
  0x92   : > { %912 = vmatpush2.bf16.msra.mxu0 %v2033_v57 }
  0x93   : > { %1320 = vmatprep.subr.bf16.mxu0 %v2229_v62 }
  0x95   : > { %914 = vmatmul.mubr.bf16.vlgmr.msra.gmra.mxu0 %v749_v60 }
  0x96   : > { %1807 = vmatprep.mubr.msk.bf16.mxu0 %vm474_vm0, %v751_v31  ;;  %1321 = vmatpush1.bf16.msra.mxu0 %v2037_v61  ;;  %v2056_v31 = vld [vmem:[#allocation6 + $0xa8] sm:$0xff]   ;;  %v938_v61 = vld [vmem:[%s2570_s3] sm:$0x3] }
  0x97   : > { %1322 = vmatprep.subr.bf16.mxu0 %v2229_v62  ;;  %1208 = vmatpush2.bf16.msra.mxu1 %v2056_v31 }
  0x98   : > { %1209 = vmatprep.subr.bf16.mxu1 %v2229_v62 }
  0x9a   : > { %1323 = vmatpush1.bf16.msra.mxu0 %v2039_v47 }
  0x9b   : > { %1324 = vmatprep.subr.bf16.mxu0 %v2229_v62  ;;  %1210 = vmatpush2.bf16.msra.mxu1 %v2058_v39 }
  0x9c   : > { %1519 = vmatprep.subr.bf16.mxu1 %v2229_v62 }
  0x9d   : > { %924 = vmatmul.mubr.bf16.gmra.mxu0 %v748_v59  ;;  %v941_v59 = vshrl.u32 %v940_v58, 7 }
  0x9e   : > { %1325 = vmatpush1.bf16.msra.mxu0 %v2041_v0  ;;  %1839 = vmatprep.mubr.msk.bf16.mxu0 %vm474_vm0, %v1243_v37 }
  0x9f   : > { %1326 = vmatprep.subr.bf16.mxu0 %v2229_v62  ;;  %v942_v60 = vsub.s32 0, %v941_v59  ;;  %v946_v47 = vsub.s32 1, %v941_v59 }
  0xa1   : > { %v943_v0 = vrot.slane %v938_v61, %v942_v60 }
  0xa2   : > { %1327 = vmatpush1.bf16.msra.mxu0 %v2043_v2 }
  0xa3   : > { %1328 = vmatprep.subr.bf16.mxu0 %v2229_v62 }
  0xa6   : > { %1329 = vmatpush1.bf16.msra.mxu0 %v2045_v4  ;;  %v947_v4 = vrot.slane %v938_v61, %v946_v47 }
  0xa7   : > { %1330 = vmatprep.subr.bf16.mxu0 %v2229_v62 }
  0xaa   : > { %1331 = vmatpush1.bf16.msra.mxu0 %v2047_v6 }
  0xab   : > { %1332 = vmatprep.subr.bf16.mxu0 %v2229_v62 }
  0xae   : > { %1333 = vmatpush1.bf16.msra.mxu0 %v2049_v8 }
  0xaf   : > { %1334 = vmatprep.subr.bf16.mxu0 %v2229_v62 }
  0xb2   : > { %1335 = vmatpush1.bf16.msra.mxu0 %v2051_v10 }
  0xb3   : > { %1344 = vmatprep.subr.bf16.mxu0 %v2229_v62 }
  0xb6   : > { %1345 = vmatpush2.bf16.msra.mxu0 %v2053_v12 }
  0xb7   : > { %1346 = vmatprep.subr.bf16.mxu0 %v2229_v62 }
  0xba   : > { %1347 = vmatpush2.bf16.msra.mxu0 %v2055_v14 }
  0xbb   : > { %1348 = vmatprep.subr.bf16.mxu0 %v2229_v62 }
  0xbe   : > { %1349 = vmatpush2.bf16.msra.mxu0 %v2057_v18 }
  0xbf   : > { %1350 = vmatprep.subr.bf16.mxu0 %v2229_v62 }
  0xc2   : > { %1351 = vmatpush2.bf16.msra.mxu0 %v2059_v24 }
 0x125   : > { %v515_v40 = vpop.f32.mrf.mxu0 }
 0x126   : > { %v692_v41 = vpop.f32.mrf.mxu1 }
 0x127   : > { %v517_v42 = vpop.f32.mrf.mxu0  ;;  %v693_v63 = vadd.f32 %v692_v41, %v515_v40 }
 0x128   : > { %v694_v43 = vpop.f32.mrf.mxu1 }
 0x129   : > { %v519_v45 = vpop.f32.mrf.mxu0  ;;  %v695_v2 = vadd.f32 %v694_v43, %v517_v42 }
 0x12a   : > { %v696_v46 = vpop.f32.mrf.mxu1 }
 0x12b   : > { %v521_v48 = vpop.f32.mrf.mxu0  ;;  %v697_v6 = vadd.f32 %v696_v46, %v519_v45 }
 0x12c   : > { %v698_v49 = vpop.f32.mrf.mxu1 }
 0x12d   : > { %v525_v50 = vpop.f32.mrf.mxu0  ;;  %v699_v10 = vadd.f32 %v698_v49, %v521_v48 }
 0x12e   : > { %v702_v51 = vpop.f32.mrf.mxu1 }
 0x12f   : > { %v527_v52 = vpop.f32.mrf.mxu0  ;;  %v703_v14 = vadd.f32 %v702_v51, %v525_v50  ;;  %v1000_v51 = vld [vmem:[%s2357_s9 + $0x20] sm:$0x1] }
 0x130   : > { %v704_v53 = vpop.f32.mrf.mxu1 }
 0x131   : > { %v529_v54 = vpop.f32.mrf.mxu0  ;;  %v705_v19 = vadd.f32 %v704_v53, %v527_v52  ;;  %v1363_v53 = vld [vmem:[%s2357_s9 + $0x8] sm:$0xf8] }
 0x132   : > { %v706_v55 = vpop.f32.mrf.mxu1  ;;  %v1381_v60 = vpack.c.bf16 %v2360_v38, %v1363_v53  ;;  %v2062_v53 = vld [vmem:[#allocation6 + $0xe8] sm:$0xff]  }
 0x133   : > { %v530_v56 = vpop.f32.mrf.mxu0  ;;  %v998_v55 = vld [vmem:[%s2357_s9] sm:$0xfe] }
 0x134   : > { %v707_v57 = vpop.f32.mrf.mxu1  ;;  %v1364_v56 = vld [vmem:[%s2357_s9 + $0x28] sm:$0x7]  ;;  %v1427_v38 = vshrl.u32 %v1381_v60, 16 }
 0x155   : > { %v915_v1 = vpop.f32.mrf.mxu0 }
 0x156   : > { %v932_v3 = vadd.f32 %v915_v1, %v693_v63  ;;  %v1382_v1 = vpack.c.bf16 %v1364_v56, %v1364_v56  ;;  %v2064_v56 = vld [vmem:[#allocation6 + $0xd8] sm:$0xff]  }
 0x157   : > { %v917_v5 = vpop.f32.mrf.mxu0 }
 0x158   : > { %v950_v7 = vadd.f32 %v943_v0, %v932_v3  ;;  %v933_v8 = vadd.f32 %v917_v5, %v695_v2 }
 0x159   : > { %v919_v9 = vpop.f32.mrf.mxu0 }
 0x15a   : > { %v1808_v11 = vmul.f32 -1.442695, %v950_v7  ;;  %v951_v12 = vadd.f32 %v947_v4, %v933_v8  ;;  %v934_v13 = vadd.f32 %v919_v9, %v697_v6 }
 0x15b   : > { %v921_v15 = vpop.f32.mrf.mxu0 }
 0x15c   : > { %2072 = vpow2.f32 %v1808_v11  ;;  %v1809_v16 = vmul.f32 -1.442695, %v951_v12  ;;  %v952_v17 = vadd.f32 %v943_v0, %v934_v13  ;;  %v935_v18 = vadd.f32 %v921_v15, %v699_v10  ;;  %v2461_v13 = vld [vmem:[%s2357_s9] sm:$0xfc] }
 0x15d   : > { %v925_v20 = vpop.f32.mrf.mxu0  ;;  %v1430_v11 = vshll.u32 %v1381_v60, 16  ;;  %v1435_v12 = vshrl.u32 %v1382_v1, 16 }
 0x15e   : > { %2074 = vpow2.f32 %v1809_v16  ;;  %v1810_v21 = vmul.f32 -1.442695, %v952_v17  ;;  %v953_v22 = vadd.f32 %v947_v4, %v935_v18  ;;  %v936_v23 = vadd.f32 %v925_v20, %v703_v14 }
 0x15f   : > { %v927_v24 = vpop.f32.mrf.mxu0  ;;  %v1438_v17 = vshll.u32 %v1382_v1, 16 }
 0x160   : > { %2076 = vpow2.f32 %v1810_v21  ;;  %v1811_v25 = vmul.f32 -1.442695, %v953_v22  ;;  %v954_v26 = vadd.f32 %v943_v0, %v936_v23  ;;  %v937_v27 = vadd.f32 %v927_v24, %v705_v19 }
 0x161   : > { %v929_v28 = vpop.f32.mrf.mxu0  ;;  %v1429_v21 = vrot.slane %v1427_v38, 1 }
 0x162   : > { %2078 = vpow2.f32 %v1811_v25  ;;  %v1812_v29 = vmul.f32 -1.442695, %v954_v26  ;;  %v955_v30 = vadd.f32 %v947_v4, %v937_v27  ;;  %v1047_v27 = vld [vmem:[%s2357_s9 + $0x20] sm:$0x3] }
 0x163   : > { %v930_v31 = vpop.f32.mrf.mxu0 }
 0x164   : > { %2080 = vpow2.f32 %v1812_v29  ;;  %v1813_v32 = vmul.f32 -1.442695, %v955_v30  ;;  %v1432_v29 = vrot.slane %v1430_v11, 2  ;;  %v1437_v30 = vrot.slane %v1435_v12, 1 }
 0x165   : > { %v1440_v31 = vrot.slane %v1438_v17, 2 }
 0x166   : > { %2082 = vpow2.f32 %v1813_v32 }
 0x169   : > { %v2073_v33 = vpop.eup %2072 }
 0x16a   : > { %v974_v34 = vadd.f32 1.0, %v2073_v33 }
 0x16b   : > { %v2075_v35 = vpop.eup %2074 }
 0x16c   : > { %2084 = vrcp.f32 %v974_v34  ;;  %v975_v36 = vadd.f32 1.0, %v2075_v35 }
 0x16d   : > { %v2077_v37 = vpop.eup %2076 }
 0x16e   : > { %2086 = vrcp.f32 %v975_v36  ;;  %v976_v39 = vadd.f32 1.0, %v2077_v37 }
 0x16f   : > { %v2079_v40 = vpop.eup %2078 }
 0x170   : > { %2088 = vrcp.f32 %v976_v39  ;;  %v977_v41 = vadd.f32 1.0, %v2079_v40  ;;  %v1433_v40 = vor.u32 %v1432_v29, %v1429_v21 }
 0x171   : > { %v2081_v42 = vpop.eup %2080 }
 0x172   : > { %2090 = vrcp.f32 %v977_v41  ;;  %v978_v43 = vadd.f32 1.0, %v2081_v42  ;;  %v1441_v41 = vor.u32 %v1440_v31, %v1437_v30 }
 0x173   : > { %v2083_v45 = vpop.eup %2082 }
 0x174   : > { %2092 = vrcp.f32 %v978_v43  ;;  %v979_v46 = vadd.f32 1.0, %v2083_v45 }
 0x176   : > { %2094 = vrcp.f32 %v979_v46 }
 0x179   : > { %v2085_v48 = vpop.eup %2084 }
 0x17a   : > { %992 = vst [vmem:[#allocation2 + $0x28] sm:$0xff] %v2085_v48  ;;  %v1009_v52 = vrot.slane %v2085_v48, 7 }
 0x17b   : > { %v2087_v49 = vpop.eup %2086 }
 0x17c   : > { %993 = vst [vmem:[#allocation2 + $0x10] sm:$0xff] %v2087_v49  ;;  %v1015_v63 = vmul.f32 %v1009_v52, %v998_v55  ;;  %v2060_v49 = vld [vmem:[#allocation6 + $0xf8] sm:$0xff]   ;;  %v2063_v55 = vld [vmem:[#allocation6 + $0xe0] sm:$0xff]  }
 0x17d   : > { %v2089_v50 = vpop.eup %2088 }
 0x17e   : > { %v2445_v54 = vrot.slane %v2089_v50, 7  ;;  %v1442_v50 = vsel %vm1408_vm4, %v1433_v40, %v1441_v41 }
 0x17f   : > { %v2449_v57 = vpop.eup %2090 }
 0x180   : > { %v1011_v58 = vsel %vm1008_vm3, %v1009_v52, %v2445_v54  ;;  %v1017_v59 = vmul.f32 %v2445_v54, %v1000_v51  ;;  %v1577_v3 = vsub.f32 1.0, %v2449_v57  ;;  %v2061_v52 = vld [vmem:[#allocation6 + $0xf0] sm:$0xff]  }
 0x181   : > { %v2093_v61 = vpop.eup %2092  ;;  %v1050_v47 = vld [vmem:[#allocation2 + $0x28] sm:$0xfe]  ;;  %v1016_v0 = vmul.f32 %v1011_v58, %v2370_v44  ;;  %v2065_v58 = vld [vmem:[#allocation6 + $0xd0] sm:$0xff]  }
 0x182   : > { %996 = vst [vmem:[#allocation2 + $0x18] sm:$0xff] %v2093_v61  ;;  %v1054_v2 = vrot.slane %v1050_v47, 7  ;;  %v1019_v4 = vpack.c.bf16 %v1017_v59, %v1017_v59  ;;  %v1583_v16 = vrot.slane %v1577_v3, 7  ;;  %v1365_v60 = vld [vmem:[#allocation2 + $0x28] sm:$0xfc]  ;;  %v2066_v47 = vld [vmem:[#allocation6 + $0xc8] sm:$0xff]  }
 0x183   : > { %v2095_v5 = vpop.eup %2094  ;;  %v2457_v6 = vld [vmem:[#allocation2 + $0x10] sm:$0xfe]  ;;  %v1018_v7 = vpack.c.bf16 %v1016_v0, %v1015_v63  ;;  %v1369_v63 = vrot.slane %v1365_v60, 7  ;;  %v1362_v0 = vld [vmem:[%s2357_s9 + $0x20] sm:$0x7] }
 0x184   : > { %997 = vst [vmem:[#allocation2 + $0x20] sm:$0xff] %v2095_v5  ;;  %v1576_v8 = vsub.f32 1.0, %v2457_v6  ;;  %v1228_v10 = vshll.u32 %v1019_v4, 16  ;;  %v1055_v14 = vsel %vm1008_vm3, %v1054_v2, %v2445_v54  ;;  %v1061_v23 = vmul.f32 %v1054_v2, %v2461_v13  ;;  %v2067_v2 = vld [vmem:[#allocation6 + $0xc0] sm:$0xff]   ;;  %v1361_v3 = vld [vmem:[%s2357_s9] sm:$0xf8] }
 0x185   : > { %v1223_v9 = vshll.u32 %v1018_v7, 16  ;;  %v1221_v18 = vshrl.u32 %v1018_v7, 16  ;;  %v1062_v24 = vmul.f32 %v1055_v14, %v2370_v44  ;;  %v1370_v4 = vsel %vm1008_vm3, %v1369_v63, %v2445_v54  ;;  %v2068_v7 = vld [vmem:[#allocation6 + $0x118] sm:$0xff]  }
 0x186   : > { %v2465_v15 = vrot.slane %v1576_v8, 7  ;;  %v1230_v26 = vrot.slane %v1228_v10, 1  ;;  %v1376_v8 = vmul.f32 %v1369_v63, %v1361_v3  ;;  %v1377_v38 = vmul.f32 %v1370_v4, %v2370_v44  ;;  %v2069_v10 = vld [vmem:[#allocation6 + $0x110] sm:$0xff]   ;;  %v2071_v44 = vld [vmem:[#allocation6 + $0x100] sm:$0xff]  }
 0x187   : > { %v1225_v19 = vrot.slane %v1223_v9, 1  ;;  %v1064_v37 = vpack.c.bf16 %v1062_v24, %v1061_v23 }
 0x188   : > { %v2469_v20 = vsel %vm1008_vm3, %v2465_v15, %v1583_v16  ;;  %v1379_v11 = vpack.c.bf16 %v1377_v38, %v1376_v8 }
 0x189   : > { %v1051_v22 = vld [vmem:[#allocation2 + $0x18] sm:$0x1]  ;;  %v1226_v25 = vor.u32 %v1225_v19, %v1221_v18  ;;  %v1097_v45 = vrot.slane %v1064_v37, 1 }
 0x18a   : > { %v1056_v28 = vrot.slane %v1051_v22, 7  ;;  %v1366_v59 = vld [vmem:[#allocation2 + $0x18] sm:$0x3]  ;;  %v1410_v17 = vshrl.u32 %v1379_v11, 16 }
 0x18b   : > { %v2474_v32 = vld [vmem:[#allocation2 + $0x20] sm:$0x1]  ;;  %v1231_v33 = vsel %vm321_vm1, %v1226_v25, %v1230_v26  ;;  %v1371_v61 = vrot.slane %v1366_v59, 7 }
 0x18c   : > { %v1057_v34 = vsel %vm1008_vm3, %v2445_v54, %v1056_v28  ;;  %v1578_v35 = vsub.f32 1.0, %v2474_v32  ;;  %1353 = vmatmul.mubr.bf16.vlgmr.msra.gmra.mxu0 %v1231_v33  ;;  %v1412_v21 = vrot.slane %v1410_v17, 1 }
 0x18d   : > { %v1063_v36 = vmul.f32 %v1057_v34, %v1047_v27  ;;  %v1372_v1 = vsel %vm1008_vm3, %v2445_v54, %v1371_v61  ;;  %v1413_v54 = vshll.u32 %v1379_v11, 16 }
 0x18e   : > { %v1585_v39 = vrot.slane %v1578_v35, 7  ;;  %v1378_v5 = vmul.f32 %v1372_v1, %v1362_v0 }
 0x18f   : > { %v1065_v42 = vpack.c.bf16 %v1063_v36, %v1063_v36  ;;  %v1415_v22 = vrot.slane %v1413_v54, 2 }
 0x190   : > { %v1586_v43 = vsel %vm1008_vm3, %v1583_v16, %v1585_v39  ;;  %v1380_v9 = vpack.c.bf16 %v1378_v5, %v1378_v5  ;;  %v2070_v16 = vld [vmem:[#allocation6 + $0x108] sm:$0xff]  }
 0x191   : > { %v1098_v46 = vrot.slane %v1065_v42, 1  ;;  %v2481_v48 = vmul.f32 %v1586_v43, %v1047_v27  ;;  %v1416_v24 = vor.u32 %v1415_v22, %v1412_v21 }
 0x192   : > { %v1418_v12 = vshrl.u32 %v1380_v9, 16  ;;  %v1421_v14 = vshll.u32 %v1380_v9, 16 }
 0x193   : > { %v1099_v51 = vsel %vm746_vm2, %v1097_v45, %v1098_v46 }
 0x194   : > { %1212 = vmatmul.mubr.bf16.vlgmr.msra.gmra.mxu1 %v1099_v51  ;;  %v1420_v18 = vrot.slane %v1418_v12, 1  ;;  %v1423_v19 = vrot.slane %v1421_v14, 2 }
 0x195   : > { %1520 = vmatpush1.bf16.msra.mxu1 %v2060_v49  ;;  %1852 = vmatprep.mubr.msk.bf16.mxu1 %vm474_vm0, %v1442_v50  ;;  %v1597_v49 = vrot.slane %v2457_v6, 1  ;;  %v1598_v50 = vrot.slane %v2449_v57, 1 }
 0x196   : > { %1521 = vmatprep.subr.bf16.mxu1 %v2229_v62  ;;  %v1424_v23 = vor.u32 %v1423_v19, %v1420_v18 }
 0x198   : > { %v1425_v25 = vsel %vm1408_vm4, %v1416_v24, %v1424_v23 }
 0x199   : > { %1522 = vmatpush1.bf16.msra.mxu1 %v2061_v52  ;;  %v1600_v52 = vrot.slane %v2474_v32, 1  ;;  %v2100_v32 = vld [vmem:[%s2357_s9 + $0x10] sm:$0xff]  ;;  %s2159_s9 = scalar_lea.vmem %s2158_s8, 512 }
 0x19a   : > { %1523 = vmatprep.subr.bf16.mxu1 %v2229_v62  ;;  %p2161_p0 = scmp.lt.s32.totalorder %s2159_s9, %s2153_s6 }
 0x19b   : > { %v1601_v60 = vsel %vm746_vm2, %v1598_v50, %v1600_v52 }
 0x19c   : > { %p2162_p1 = por %p2161_p0, %p2160_p11 }
 0x19d   : > { %1524 = vmatpush1.bf16.msra.mxu1 %v2062_v53  ;;  %v1599_v53 = vsel %vm746_vm2, %v1597_v49, %v1598_v50 }
 0x19e   : > { %1525 = vmatprep.subr.bf16.mxu1 %v2229_v62  ;;  %p2163_p3 = pnand %p2162_p1, %p2156_p8 }
 0x1a1   : > { %1526 = vmatpush1.bf16.msra.mxu1 %v2063_v55 }
 0x1a2   : > { %1527 = vmatprep.subr.bf16.mxu1 %v2229_v62 }
 0x1a5   : > { %1528 = vmatpush1.bf16.msra.mxu1 %v2064_v56  ;;  %v1590_v56 = vmul.f32 %v2465_v15, %v2461_v13 }
 0x1a6   : > { %1529 = vmatprep.subr.bf16.mxu1 %v2229_v62 }
 0x1a9   : > { %1530 = vmatpush1.bf16.msra.mxu1 %v2065_v58 }
 0x1aa   : > { %1531 = vmatprep.subr.bf16.mxu1 %v2229_v62 }
 0x1ad   : > { %1532 = vmatpush1.bf16.msra.mxu1 %v2066_v47  ;;  %v1591_v47 = vmul.f32 %v2100_v32, %v2469_v20 }
 0x1ae   : > { %1533 = vmatprep.subr.bf16.mxu1 %v2229_v62 }
 0x1b1   : > { %1534 = vmatpush1.bf16.msra.mxu1 %v2067_v2 }
 0x1b2   : > { %1543 = vmatprep.subr.bf16.mxu1 %v2229_v62 }
 0x1b5   : > { %1544 = vmatpush2.bf16.msra.mxu1 %v2068_v7 }
 0x1b6   : > { %1545 = vmatprep.subr.bf16.mxu1 %v2229_v62 }
 0x1b9   : > { %1546 = vmatpush2.bf16.msra.mxu1 %v2069_v10 }
 0x1ba   : > { %1547 = vmatprep.subr.bf16.mxu1 %v2229_v62 }
 0x1bd   : > { %1548 = vmatpush2.bf16.msra.mxu1 %v2070_v16 }
 0x1be   : > { %1549 = vmatprep.subr.bf16.mxu1 %v2229_v62  ;;  %v1853_v62 = vld [vmem:[%s2571_s4] ss:$0 sm:$0xff] }
 0x1c1   : > { %1550 = vmatpush2.bf16.msra.mxu1 %v2071_v44 }
 0x1c4   : > { %1552 = vmatmul.mubr.bf16.vlgmr.msra.gmra.mxu1 %v1425_v25 }
 0x24c   : > { %v1354_v26 = vpop.f32.mrf.mxu0 }
 0x24e   : > { %v1356_v27 = vpop.f32.mrf.mxu0 }
 0x250   : > { %v1357_v28 = vpop.f32.mrf.mxu0 }
 0x252   : > { %v1359_v29 = vpop.f32.mrf.mxu0 }
 0x254   : > { %v1213_v30 = vpop.f32.mrf.mxu1 }
 0x255   : > { %v1355_v35 = vadd.f32 %v1354_v26, %v1213_v30 }
 0x256   : > { %v1215_v31 = vpop.f32.mrf.mxu1 }
 0x258   : > { %v1216_v33 = vpop.f32.mrf.mxu1 }
 0x259   : > { %v1358_v40 = vadd.f32 %v1357_v28, %v1216_v33 }
 0x25a   : > { %v1218_v34 = vpop.f32.mrf.mxu1 }
 0x284   : > { %v1553_v36 = vpop.f32.mrf.mxu1 }
 0x285   : > { %v1560_v37 = vadd.f32 %v1553_v36, %v1355_v35 }
 0x286   : > { %v1555_v39 = vpop.f32.mrf.mxu1 }
 0x287   : > { %v1569_v41 = vadd.f32 %v1853_v62, %v1560_v37 }
 0x288   : > { %v1556_v42 = vpop.f32.mrf.mxu1 }
 0x289   : > { %2096 = vtanh.f32 %v1569_v41  ;;  %v1561_v43 = vadd.f32 %v1556_v42, %v1358_v40 }
 0x28a   : > { %v1558_v45 = vpop.f32.mrf.mxu1 }
 0x28b   : > { %v1570_v46 = vadd.f32 %v1853_v62, %v1561_v43 }
 0x28d   : > { %2098 = vtanh.f32 %v1570_v46 }
 0x296   : > { %v2097_v51 = vpop.eup %2096 }
 0x297   : > { %v1604_v55 = vmul.f32 %v2097_v51, %v1599_v53 }
 0x299   : > { %v1609_v58 = vrot.slane %v1604_v55, 6 }
 0x29a   : > { %v2099_v59 = vpop.eup %2098 }
 0x29b   : > { %v1615_v61 = vadd.f32 %v1609_v58, %v1590_v56  ;;  %v1605_v6 = vmul.f32 %v2099_v59, %v1601_v60 }
 0x29d   : > { %v1610_v57 = vrot.slane %v1605_v6, 6  ;;  %1618 = vst [vmem:[%s247_s17 - $0x2] sm:$0xfc] %v1615_v61 }
 0x29f   : > { %v1611_v63 = vsel %vm1608_vm5, %v1609_v58, %v1610_v57  ;;  %v1617_v0 = vadd.f32 %v1610_v57, %v2481_v48 }
 0x2a0   : > { %v1616_v13 = vadd.f32 %v1611_v63, %v1591_v47 }
 0x2a1   : > { %1620 = vst [vmem:[%s247_s17 + $0xe] sm:$0x3] %v1617_v0 }
 0x2a2   : > { %1619 = vst [vmem:[%s247_s17 + $0x6] sm:$0xff] %v1616_v13 }
 0x2a3   : > { %2166 = shalt.err (!%p2163_p3)
}
 0x2a4   : > { %s2167_s10 = scalar_lea.hbm %s2523_s30, 256  ;;  %s2171_s13 = scalar_lea.hbm %s2572_s5, 512 }
 0x2a5   : > { %p2168_p2 = scmp.ne.s32.totalorder %s2523_s30, %s2167_s10  ;;  %p2172_p6 = scmp.lt.s32.totalorder %s2523_s30, %s2572_s5 }
 0x2a6   : > { %p2173_p9 = scmp.lt.s32.totalorder %s2171_s13, %s2167_s10 }
 0x2a7   : > { %p2169_p4 = pnand %p2168_p2, %p2301_p5 }
 0x2a8   : > { %p2174_p10 = por %p2173_p9, %p2172_p6 }
 0x2a9   : > { %p2170_p13 = pneg %p2169_p4 }
 0x2ab   : > { %p2175_p12 = pnand %p2174_p10, %p2170_p13 }
 0x2ad   : > { %2178 = shalt.err (!%p2175_p12)
}
 0x2ae   : > { %s2231_s16 = smov 128   ;;  %s2232_s17 = smov 8  }
 0x2af   : > { %1869 = dma.vmem_to_hbm [thread:$0]  (%p2301_p5), %s2525_s23, 256, %s2523_s30, %s2527_s22, %s2231_s16, %s2231_s16, %s2232_s17  }
 0x2b0 PF: > { %p1886_p7 = scmp.ge.s32.totalorder %s2221_s21, 2  ;;  %s1650_s25 = sand.u32 1, %s2209_s18  }
 0x2b1   : > { %p2582_p8 = scmp.ne.s32.totalorder %s2575_s29, 0  ;;  %s1651_s26 = scalar_lea.sflag [#allocation5], %s1650_s25 }
 0x2b3   : > { %p1879_p11 = pnand %p1886_p7, %p2582_p8 }
 0x2b5   : > { %p1880_p0 = pneg %p1879_p11 }
 0x2b7   : > { %2204 = dma.done.wait (%p1880_p0), %s1651_s26, 256  }
 0x2b8   : > { %2206 = vsyncadd (%p1880_p0), %s1651_s26, 4294967040  ;;  %p17_p1 = scmp.ge.s32.totalorder %s2288_s24, 4   ;;  %s2583_s18 = smov %s2213_s19 }
 0x2b9   : > { %s2584_s19 = smov %s2217_s20  ;;  %s2585_s20 = smov %s2299_s27 }
 0x2ba   : > { %s2586_s21 = smov %s2288_s24  ;;  %19 = sbr.rel (!%p17_p1) target bundleno = 5 (0x5), region = 88 }
 0x2bf   :  { %1656 = vsyncpa [#allocation4], 1 }
 0x2c0   :  { %1658 = vsyncpa [#allocation4 + $0x1], 1 }
 0x2c1   :  { %1659 = vsyncpa [#allocation7], 1 }
 0x2c2   :  { %1660 = vsyncpa [#allocation5], 1 }
 0x2c3   :  { %1662 = vsyncpa [#allocation5 + $0x1], 1 }

// kernel: step.1
= control target key start
LH: loop header
LB: loop body
LE: loop exit
PB: predicated region body
PF: predicated region fallthrough
CT: control target
= control target key end

     0   :  { %10 = vsyncpa [#allocation4], 0  ;;  %s2567_s0 = inlined_call_operand.vmem [shape: f32[2,26,192], index: 0, kind: input, shape index: {}]   ;;  %s2568_s1 = inlined_call_operand.hbm [shape: bf16[3,192,256], index: 1, kind: input, shape index: {}]   ;;  %s2569_s2 = inlined_call_operand.hbm [shape: bf16[3,192,128], index: 2, kind: input, shape index: {}]   ;;  %s2570_s3 = inlined_call_operand.vmem [shape: f32[1,256], index: 3, kind: input, shape index: {}]   ;;  %s2571_s4 = inlined_call_operand.vmem [shape: f32[1,128], index: 4, kind: input, shape index: {}]   ;;  %s2572_s5 = inlined_call_operand.hbm [shape: f32[2,16,128], index: 5, kind: output, shape index: {}]  }
   0x1   :  { %11 = vsyncpa [#allocation7], 0 }
   0x2   :  { %12 = vsyncpa [#allocation5], 0 }
   0x3   :  { %14 = vsyncpa [#allocation5 + $0x1], 0  ;;  %s2263_s18 = smov 0   ;;  %s2265_s19 = smov 0  }
   0x4   :  { %s2267_s20 = smov 0   ;;  %s2269_s21 = smov 0  }
   0x5 LB: > { %s2284_s22 = sadd.s32 4294967295, %s2221_s21   ;;  %s1719_s23 = sadd.s32 4294967294, %s2221_s21   ;;  %s2221_s21 = sphi %s2269_s21, %s2586_s21   ;;  %s2217_s20 = sphi %s2267_s20, %s2585_s20   ;;  %s2213_s19 = sphi %s2265_s19, %s2584_s19   ;;  %s2209_s18 = sphi %s2263_s18, %s2583_s18  }
   0x6   : > { %s2288_s24 = sadd.s32 1, %s2221_s21   ;;  %s137_s25 = sadd.s32 1, %s2217_s20 }
   0x7   : > { %s134_s26 = ssub.s32 %s2221_s21, %s2288_s24  ;;  %p147_p0 = scmp.ne.s32.totalorder %s2217_s20, %s2213_s19 }
   0x8   : > { %p135_p1 = scmp.eq.s32.totalorder %s134_s26, 0  ;;  %p148_p2 = scmp.eq.s32.totalorder %s2284_s22, 1 }
   0x9   : > { %p153_p3 = scmp.ne.s32.totalorder %s2213_s19, %s2209_s18  ;;  %p154_p4 = scmp.eq.s32.totalorder %s1719_s23, 1 }
   0xa   : > { %s2299_s27 = scalar_select %p135_p1, %s2217_s20, %s137_s25  }
   0xb   : > { %p2301_p5 = por %p148_p2, %p147_p0  ;;  %p2305_p6 = por %p154_p4, %p153_p3 }
   0xc   : > { %p1720_p7 = scmp.ge.s32.totalorder %s2221_s21, 1  ;;  %p161_p8 = scmp.lt.s32.totalorder %s2221_s21, 3 }
   0xd   : > { %s2575_s29 = scalar_select %p2305_p6, 1, 0 }
   0xe   : > { %p2573_p9 = scmp.eq.s32.totalorder %s2284_s22, 0  ;;  %p2312_p10 = pnand %p1720_p7, %p161_p8 }
   0xf   : > { %s2223_s6 = smov [#allocation3]   ;;  %s2224_s9 = smov [#allocation6]  }
  0x10   : > { %s173_s7 = sshll.u32 %s2223_s6, 4  ;;  %p1871_p11 = pneg %p2312_p10  ;;  %s174_s7 = int_to_ptr.vmem [resolvable:$true] %s173_s7 }
  0x11   : > { %s186_s10 = sshll.u32 %s2224_s9, 4  ;;  %s2112_s11 = scalar_lea.vmem %s174_s7, 9216  ;;  %s187_s10 = int_to_ptr.vmem [resolvable:$true] %s186_s10 }
  0x12   : > { %p2320_p12 = pnand %p2573_p9, %p1871_p11  ;;  %p2113_p0 = scmp.ne.s32.totalorder %s174_s7, %s2112_s11 }
  0x13   : > { %p2120_p3 = scmp.lt.s32.totalorder %s174_s7, %s174_s7  ;;  %p2121_p4 = scmp.lt.s32.totalorder %s2112_s11, %s2112_s11 }
  0x14   : > { %p2103_p13 = pneg %p2320_p12 }
  0x15   : > { %p2122_p7 = por %p2121_p4, %p2120_p3 }
  0x16   : > { %p2115_p1 = pnand %p2113_p0, %p2103_p13 }
  0x18   : > { %p2116_p2 = pneg %p2115_p1 }
  0x1a   : > { %p2123_p8 = pnand %p2122_p7, %p2116_p2 }
  0x1c   : > { %2126 = shalt.err (!%p2123_p8)
}
  0x1d   : > { %s2225_s12 = smov 128   ;;  %s2226_s13 = smov 8  }
  0x1e   : > { %1874 = dma.hbm_to_vmem [thread:$0]  (!%p2320_p12), %s2568_s1, 9216, %s174_s7, [#allocation4], %s2225_s12, %s2225_s12, %s2226_s13  }
  0x1f   : > { %s2138_s16 = scalar_lea.vmem %s187_s10, 4608  ;;  %p2146_p9 = scmp.lt.s32.totalorder %s187_s10, %s187_s10 }
  0x20   : > { %p2139_p11 = scmp.ne.s32.totalorder %s187_s10, %s2138_s16  ;;  %p2147_p6 = scmp.lt.s32.totalorder %s2138_s16, %s2138_s16 }
  0x22   : > { %p2141_p0 = pnand %p2139_p11, %p2103_p13  ;;  %p2148_p3 = por %p2147_p6, %p2146_p9 }
  0x24   : > { %p2142_p1 = pneg %p2141_p0 }
  0x26   : > { %p2149_p2 = pnand %p2148_p3, %p2142_p1 }
  0x28   : > { %2152 = shalt.err (!%p2149_p2)
}
  0x29   : > { %s2227_s17 = smov 64   ;;  %s2228_s23 = smov 4  }
  0x2a   : > { %1877 = dma.hbm_to_vmem [thread:$0]  (!%p2320_p12), %s2569_s2, 4608, %s187_s10, [#allocation7], %s2227_s17, %s2227_s17, %s2228_s23  }
  0x2b   : > { %216 = sbr.rel (%p2312_p10) target bundleno = 688 (0x2b0), region = 40  ;;  %p2578_p4 = scmp.eq.s32.totalorder (!%p2312_p10), %s2284_s22, 0 }
  0x30   : > { %2196 = dma.done.wait (%p2578_p4), [#allocation4], 9216   ;;  %p2579_p13 = pmov %p2578_p4 }
  0x31   : > { %p2580_p6 = pmov %p2578_p4 }
  0x32   : > { %2198 = vsyncadd (%p2579_p13), [#allocation4], 4294958080 }
  0x33   : > { %2200 = dma.done.wait (%p2580_p6), [#allocation7], 4608   ;;  %p2581_p9 = pmov %p2578_p4 }
  0x34   : > { %v1928_v0 = vld [vmem:[#allocation3 + $0x134] ss:$8 sps:$4 sm:$0xff]   ;;  %v1932_v2 = vld [vmem:[#allocation3 + $0x130] ss:$8 sps:$4 sm:$0xff]   ;;  %v1934_v4 = vld [vmem:[#allocation3 + $0x124] ss:$8 sps:$4 sm:$0xff]  }
  0x35   : > { %2202 = vsyncadd (%p2581_p9), [#allocation7], 4294962688  ;;  %v1930_v1 = vld [vmem:[#allocation3 + $0x74] ss:$8 sps:$4 sm:$0xff]   ;;  %481 = vmatprep.subr.bf16.mxu0 %v1928_v0  ;;  %v1933_v3 = vld [vmem:[#allocation3 + $0x70] ss:$8 sps:$4 sm:$0xff]  }
  0x36   : > { %658 = vmatprep.subr.bf16.mxu1 %v1930_v1  ;;  %482 = vmatpush1.bf16.msra.mxu0 %v1932_v2  ;;  %v1936_v5 = vld [vmem:[#allocation3 + $0x64] ss:$8 sps:$4 sm:$0xff]   ;;  %v1938_v6 = vld [vmem:[#allocation3 + $0x120] ss:$8 sps:$4 sm:$0xff]   ;;  %v1940_v8 = vld [vmem:[#allocation3 + $0x114] ss:$8 sps:$4 sm:$0xff]  }
  0x37   : > { %659 = vmatpush1.bf16.msra.mxu1 %v1933_v3  ;;  %483 = vmatprep.subr.bf16.mxu0 %v1934_v4  ;;  %v1939_v7 = vld [vmem:[#allocation3 + $0x60] ss:$8 sps:$4 sm:$0xff]   ;;  %v1942_v9 = vld [vmem:[#allocation3 + $0x54] ss:$8 sps:$4 sm:$0xff]   ;;  %v1944_v10 = vld [vmem:[#allocation3 + $0x110] ss:$8 sps:$4 sm:$0xff]  }
  0x38   : > { %660 = vmatprep.subr.bf16.mxu1 %v1936_v5  ;;  %v1945_v11 = vld [vmem:[#allocation3 + $0x50] ss:$8 sps:$4 sm:$0xff]   ;;  %v1946_v12 = vld [vmem:[#allocation3 + $0x104] ss:$8 sps:$4 sm:$0xff]   ;;  %v1950_v14 = vld [vmem:[#allocation3 + $0x100] ss:$8 sps:$4 sm:$0xff]  }
  0x39   : > { %v1948_v13 = vld [vmem:[#allocation3 + $0x44] ss:$8 sps:$4 sm:$0xff]   ;;  %v1951_v15 = vld [vmem:[#allocation3 + $0x40] ss:$8 sps:$4 sm:$0xff]   ;;  %v1952_v16 = vld [vmem:[#allocation3 + $0xf4] ss:$8 sps:$4 sm:$0xff]  }
  0x3a   : > { %484 = vmatpush1.bf16.msra.mxu0 %v1938_v6  ;;  %v1954_v17 = vld [vmem:[#allocation3 + $0x34] ss:$8 sps:$4 sm:$0xff]   ;;  %v1956_v18 = vld [vmem:[#allocation3 + $0xf0] ss:$8 sps:$4 sm:$0xff]   ;;  %v1958_v20 = vld [vmem:[#allocation3 + $0xe4] ss:$8 sps:$4 sm:$0xff]  }
  0x3b   : > { %661 = vmatpush1.bf16.msra.mxu1 %v1939_v7  ;;  %485 = vmatprep.subr.bf16.mxu0 %v1940_v8  ;;  %v1957_v19 = vld [vmem:[#allocation3 + $0x30] ss:$8 sps:$4 sm:$0xff]   ;;  %v1960_v21 = vld [vmem:[#allocation3 + $0x24] ss:$8 sps:$4 sm:$0xff]   ;;  %p248_p10 = scmp.lt.s32.totalorder %s2284_s22, 1  ;;  %vm474_vm0 = vcmask 523264  }
  0x3c   : > { %662 = vmatprep.subr.bf16.mxu1 %v1942_v9  ;;  %v1962_v22 = vld [vmem:[#allocation3 + $0xe0] ss:$8 sps:$4 sm:$0xff]   ;;  %v1964_v24 = vld [vmem:[#allocation3 + $0xd4] ss:$8 sps:$4 sm:$0xff]   ;;  %v1968_v26 = vld [vmem:[#allocation3 + $0xd0] ss:$8 sps:$4 sm:$0xff]  }
  0x3d   : > { %v1963_v23 = vld [vmem:[#allocation3 + $0x20] ss:$8 sps:$4 sm:$0xff]   ;;  %v1966_v25 = vld [vmem:[#allocation3 + $0x14] ss:$8 sps:$4 sm:$0xff]   ;;  %s249_s30 = scalar_select %p248_p10, %s2284_s22, 1  ;;  %vm746_vm2 = vcmask 1046528  }
  0x3e   : > { %486 = vmatpush1.bf16.msra.mxu0 %v1944_v10  ;;  %v1969_v27 = vld [vmem:[#allocation3 + $0x10] ss:$8 sps:$4 sm:$0xff]   ;;  %v1970_v28 = vld [vmem:[#allocation3 + $0xc4] ss:$8 sps:$4 sm:$0xff]   ;;  %v1974_v30 = vld [vmem:[#allocation3 + $0xc0] ss:$8 sps:$4 sm:$0xff]  }
  0x3f   : > { %663 = vmatpush1.bf16.msra.mxu1 %v1945_v11  ;;  %487 = vmatprep.subr.bf16.mxu0 %v1946_v12  ;;  %v1972_v29 = vld [vmem:[#allocation3 + $0x4] ss:$8 sps:$4 sm:$0xff]   ;;  %s1859_s6 = sshll.u32 %s249_s30, 6  ;;  %v1975_v31 = vld [vmem:[#allocation3] ss:$8 sps:$4 sm:$0xff]   ;;  %vm1008_vm3 = vcmask 1040384  }
  0x40   : > { %664 = vmatprep.subr.bf16.mxu1 %v1948_v13  ;;  %v1976_v32 = vld [vmem:[#allocation3 + $0x174] ss:$8 sps:$4 sm:$0xff]   ;;  %s2357_s9 = scalar_lea.vmem %s2567_s0, %s1859_s6  ;;  %v1980_v34 = vld [vmem:[#allocation3 + $0x170] ss:$8 sps:$4 sm:$0xff]   ;;  %v1982_v36 = vld [vmem:[#allocation3 + $0x164] ss:$8 sps:$4 sm:$0xff]  }
  0x41   : > { %v1978_v33 = vld [vmem:[#allocation3 + $0xb4] ss:$8 sps:$4 sm:$0xff]   ;;  %v1981_v35 = vld [vmem:[#allocation3 + $0xb0] ss:$8 sps:$4 sm:$0xff]   ;;  %v1984_v37 = vld [vmem:[#allocation3 + $0xa4] ss:$8 sps:$4 sm:$0xff]  }
  0x42   : > { %488 = vmatpush1.bf16.msra.mxu0 %v1950_v14  ;;  %v2360_v38 = vld [vmem:[%s2357_s9 + $0x18] sm:$0xff]  ;;  %v2363_v39 = vld [vmem:[%s2357_s9 + $0x28] sm:$0xff]  ;;  %v2370_v44 = vld [vmem:[%s2357_s9 + $0x10] sm:$0xff]  ;;  %vm321_vm1 = vsmask.f32 7424  ;;  %s245_s14 = sand.u32 1, %s2213_s19  }
  0x43   : > { %665 = vmatpush1.bf16.msra.mxu1 %v1951_v15  ;;  %489 = vmatprep.subr.bf16.mxu0 %v1952_v16  ;;  %v289_v40 = vld [vmem:[%s2357_s9 + $0x8] sm:$0xfe]  ;;  %v291_v41 = vld [vmem:[%s2357_s9 + $0x38] sm:$0x1]  ;;  %v2375_v47 = vld [vmem:[%s2357_s9 + $0x20] sm:$0xff]  ;;  %s1727_s15 = sshll.u32 %s245_s14, 4 }
  0x44   : > { %666 = vmatprep.subr.bf16.mxu1 %v1954_v17  ;;  %v293_v42 = vpack.c.bf16 %v2360_v38, %v289_v40  ;;  %v255_v43 = vld [vmem:[%s2357_s9 + $0x8] sm:$0xff]  ;;  %v295_v45 = vpack.c.bf16 %v291_v41, %v2363_v39  ;;  %v288_v48 = vld [vmem:[%s2357_s9] sm:$0xfe]  ;;  %v290_v49 = vld [vmem:[%s2357_s9 + $0x30] sm:$0x1]  ;;  %vm1608_vm5 = vcmask 1041408  }
  0x45   : > { %v261_v46 = vpack.c.bf16 %v2360_v38, %v255_v43  ;;  %v1986_v50 = vld [vmem:[#allocation3 + $0x160] ss:$8 sps:$4 sm:$0xff]   ;;  %v292_v53 = vpack.c.bf16 %v2370_v44, %v288_v48  ;;  %v1988_v55 = vld [vmem:[#allocation3 + $0x154] ss:$8 sps:$4 sm:$0xff]   ;;  %v294_v57 = vpack.c.bf16 %v290_v49, %v2375_v47  ;;  %v1992_v61 = vld [vmem:[#allocation3 + $0x150] ss:$8 sps:$4 sm:$0xff]  }
  0x46   : > { %490 = vmatpush1.bf16.msra.mxu0 %v1956_v18  ;;  %v335_v51 = vshrl.u32 %v293_v42, 16  ;;  %v337_v52 = vshll.u32 %v293_v42, 16  ;;  %v1987_v54 = vld [vmem:[#allocation3 + $0xa0] ss:$8 sps:$4 sm:$0xff]   ;;  %v342_v56 = vshll.u32 %v295_v45, 16  ;;  %v349_v9 = vshrl.u32 %v295_v45, 16 }
  0x47   : > { %667 = vmatpush1.bf16.msra.mxu1 %v1957_v19  ;;  %491 = vmatprep.subr.bf16.mxu0 %v1958_v20  ;;  %v1990_v58 = vld [vmem:[#allocation3 + $0x94] ss:$8 sps:$4 sm:$0xff]   ;;  %v325_v60 = vshll.u32 %v292_v53, 16  ;;  %v1993_v63 = vld [vmem:[#allocation3 + $0x90] ss:$8 sps:$4 sm:$0xff]   ;;  %v323_v2 = vshrl.u32 %v292_v53, 16  ;;  %v263_v19 = vpack.c.bf16 %v2363_v39, %v2363_v39 }
  0x48   : > { %668 = vmatprep.subr.bf16.mxu1 %v1960_v21  ;;  %v339_v59 = vrot.slane %v337_v52, 1  ;;  %v344_v62 = vrot.slane %v342_v56, 1  ;;  %1780 = vmatprep.mubr.msk.bf16.mxu1 %vm474_vm0, %v261_v46  ;;  %v1994_v1 = vld [vmem:[#allocation3 + $0x144] ss:$8 sps:$4 sm:$0xff]   ;;  %v330_v4 = vshll.u32 %v294_v57, 16  ;;  %v254_v12 = vld [vmem:[%s2357_s9] sm:$0xff] }
  0x49   : > { %v327_v3 = vrot.slane %v325_v60, 1  ;;  %v1996_v5 = vld [vmem:[#allocation3 + $0x84] ss:$8 sps:$4 sm:$0xff]   ;;  %v1998_v7 = vld [vmem:[#allocation3 + $0x140] ss:$8 sps:$4 sm:$0xff]   ;;  %v260_v14 = vpack.c.bf16 %v2370_v44, %v254_v12  ;;  %v346_v20 = vshrl.u32 %v294_v57, 16 }
  0x4a   : > { %492 = vmatpush1.bf16.msra.mxu0 %v1962_v22  ;;  %v340_v0 = vor.u32 %v339_v59, %v335_v51  ;;  %v1999_v8 = vld [vmem:[#allocation3 + $0x80] ss:$8 sps:$4 sm:$0xff]   ;;  %v332_v11 = vrot.slane %v330_v4, 1  ;;  %v2002_v13 = vld [vmem:[#allocation3 + $0x1f4] ss:$8 sps:$4 sm:$0xff]   ;;  %v351_v15 = vor.u32 %v349_v9, %v344_v62  ;;  %s1860_s16 = sshll.u32 %s2284_s22, 8 }
  0x4b   : > { %669 = vmatpush1.bf16.msra.mxu1 %v1963_v23  ;;  %493 = vmatprep.subr.bf16.mxu0 %v1964_v24  ;;  %v328_v10 = vor.u32 %v327_v3, %v323_v2  ;;  %v2000_v17 = vld [vmem:[#allocation3 + $0x1f0] ss:$8 sps:$4 sm:$0xff]   ;;  %v2005_v18 = vld [vmem:[#allocation3 + $0x1e4] ss:$8 sps:$4 sm:$0xff]   ;;  %v2003_v21 = vld [vmem:[#allocation3 + $0x1e0] ss:$8 sps:$4 sm:$0xff]   ;;  %s2523_s30 = scalar_lea.hbm %s2572_s5, %s1860_s16 }
  0x4c   : > { %670 = vmatprep.subr.bf16.mxu1 %v1966_v25  ;;  %v345_v6 = vsel %vm321_vm1, %v340_v0, %v344_v62  ;;  %v710_v22 = vld [vmem:[%s2357_s9 + $0x8] sm:$0xfc]  ;;  %v712_v23 = vld [vmem:[%s2357_s9 + $0x38] sm:$0x3]  ;;  %v2023_v42 = vld [vmem:[#allocation3 + $0x184] ss:$8 sps:$4 sm:$0xff]  }
  0x4d   : > { %1754 = vmatprep.mubr.msk.bf16.mxu0 %vm474_vm0, %v345_v6  ;;  %v333_v16 = vsel %vm321_vm1, %v328_v10, %v332_v11  ;;  %v2008_v24 = vld [vmem:[#allocation3 + $0x1d4] ss:$8 sps:$4 sm:$0xff]   ;;  %v714_v25 = vpack.c.bf16 %v2360_v38, %v710_v22  ;;  %v2018_v41 = vld [vmem:[#allocation3 + $0x190] ss:$8 sps:$4 sm:$0xff]   ;;  %v2021_v43 = vld [vmem:[#allocation3 + $0x180] ss:$8 sps:$4 sm:$0xff]  }
  0x4e   : > { %494 = vmatpush1.bf16.msra.mxu0 %v1968_v26  ;;  %v716_v26 = vpack.c.bf16 %v712_v23, %v2363_v39  ;;  %v2015_v39 = vld [vmem:[#allocation3 + $0x1a0] ss:$8 sps:$4 sm:$0xff]   ;;  %v2020_v40 = vld [vmem:[#allocation3 + $0x194] ss:$8 sps:$4 sm:$0xff]   ;;  %v2024_v46 = vld [vmem:[#allocation3 + $0x230] ss:$8 sps:$4 sm:$0xff]  }
  0x4f   : > { %671 = vmatpush1.bf16.msra.mxu1 %v1969_v27  ;;  %495 = vmatprep.subr.bf16.mxu0 %v1970_v28  ;;  %v2006_v27 = vld [vmem:[#allocation3 + $0x1d0] ss:$8 sps:$4 sm:$0xff]   ;;  %v348_v28 = vor.u32 %v346_v20, %v332_v11  ;;  %v2026_v45 = vld [vmem:[#allocation3 + $0x234] ss:$8 sps:$4 sm:$0xff]   ;;  %v2029_v48 = vld [vmem:[#allocation3 + $0x224] ss:$8 sps:$4 sm:$0xff]  }
  0x50   : > { %672 = vmatprep.subr.bf16.mxu1 %v1972_v29  ;;  %v262_v29 = vpack.c.bf16 %v2375_v47, %v2375_v47  ;;  %v2027_v49 = vld [vmem:[#allocation3 + $0x220] ss:$8 sps:$4 sm:$0xff]   ;;  %v709_v51 = vld [vmem:[%s2357_s9] sm:$0xfc]  ;;  %v2035_v56 = vld [vmem:[#allocation3 + $0x204] ss:$8 sps:$4 sm:$0xff]  }
  0x51   : > { %v711_v52 = vld [vmem:[%s2357_s9 + $0x30] sm:$0x3]  ;;  %v2030_v53 = vld [vmem:[#allocation3 + $0x210] ss:$8 sps:$4 sm:$0xff]   ;;  %v2229_v62 = vmov 0   ;;  %v2041_v0 = vld [vmem:[#allocation6 + $0x28] sm:$0xff]  }
  0x52   : > { %496 = vmatpush1.bf16.msra.mxu0 %v1974_v30  ;;  %v750_v30 = vrot.slane %v714_v25, 1  ;;  %v2033_v57 = vld [vmem:[#allocation3 + $0x200] ss:$8 sps:$4 sm:$0xff]   ;;  %v2045_v4 = vld [vmem:[#allocation6 + $0x18] sm:$0xff]   ;;  %v2047_v6 = vld [vmem:[#allocation6 + $0x10] sm:$0xff]   ;;  %s247_s17 = scalar_lea.vmem [#allocation8], %s1727_s15 }
  0x53   : > { %673 = vmatpush1.bf16.msra.mxu1 %v1975_v31  ;;  %505 = vmatprep.subr.bf16.mxu0 %v1976_v32  ;;  %v751_v31 = vrot.slane %v716_v26, 1  ;;  %v2011_v32 = vld [vmem:[#allocation3 + $0x1c4] ss:$8 sps:$4 sm:$0xff]   ;;  %v2046_v9 = vld [vmem:[#allocation6 + $0x70] sm:$0xff]   ;;  %v2053_v12 = vld [vmem:[#allocation6 + $0x58] sm:$0xff]   ;;  %s1635_s23 = sshll.u32 %s247_s17, 4  ;;  %s2525_s23 = int_to_ptr.vmem [resolvable:$true] %s1635_s23 }
  0x54   : > { %682 = vmatprep.subr.bf16.mxu1 %v1978_v33  ;;  %v2043_v2 = vld [vmem:[#allocation6 + $0x20] sm:$0xff]   ;;  %v2040_v3 = vld [vmem:[#allocation6 + $0x88] sm:$0xff]   ;;  %v2054_v20 = vld [vmem:[#allocation6 + $0xb0] sm:$0xff]   ;;  %vm1408_vm4 = vsmask.f32 6400  ;;  %s2527_s22 = scalar_lea.sflag [#allocation5], %s245_s14 }
  0x55   : > { %v752_v33 = vsel %vm746_vm2, %v750_v30, %v751_v31  ;;  %v2051_v10 = vld [vmem:[#allocation6] sm:$0xff]   ;;  %v2048_v11 = vld [vmem:[#allocation6 + $0x68] sm:$0xff]   ;;  %v1048_v25 = vld [vmem:[%s2357_s9 + $0x8] sm:$0xfc]  ;;  %s2153_s6 = scalar_lea.vmem %s2525_s23, 256  ;;  %s2230_s7 = smov [#allocation8]  }
  0x56   : > { %506 = vmatpush2.bf16.msra.mxu0 %v1980_v34  ;;  %v2009_v34 = vld [vmem:[#allocation3 + $0x1c0] ss:$8 sps:$4 sm:$0xff]   ;;  %v1049_v26 = vld [vmem:[%s2357_s9 + $0x28] sm:$0x3]  ;;  %p2154_p12 = scmp.ne.s32.totalorder %s2525_s23, %s2153_s6  ;;  %s2157_s8 = sshll.u32 %s2230_s7, 4  ;;  %s2158_s8 = int_to_ptr.vmem [resolvable:$false] %s2157_s8 }
  0x57   : > { %683 = vmatpush2.bf16.msra.mxu1 %v1981_v35  ;;  %507 = vmatprep.subr.bf16.mxu0 %v1982_v36  ;;  %v2014_v35 = vld [vmem:[#allocation3 + $0x1b4] ss:$8 sps:$4 sm:$0xff]   ;;  %v2012_v36 = vld [vmem:[#allocation3 + $0x1b0] ss:$8 sps:$4 sm:$0xff]   ;;  %p2160_p11 = scmp.lt.s32.totalorder %s2525_s23, %s2158_s8 }
  0x58   : > { %684 = vmatprep.subr.bf16.mxu1 %v1984_v37  ;;  %v2017_v37 = vld [vmem:[#allocation3 + $0x1a4] ss:$8 sps:$4 sm:$0xff]   ;;  %p2155_p7 = pnand %p2154_p12, %p2301_p5 }
  0x5a   : > { %508 = vmatpush2.bf16.msra.mxu0 %v1986_v50  ;;  %v2032_v50 = vld [vmem:[#allocation3 + $0x214] ss:$8 sps:$4 sm:$0xff]   ;;  %p2156_p8 = pneg %p2155_p7 }
  0x5b   : > { %685 = vmatpush2.bf16.msra.mxu1 %v1987_v54  ;;  %509 = vmatprep.subr.bf16.mxu0 %v1988_v55  ;;  %v713_v54 = vpack.c.bf16 %v2370_v44, %v709_v51  ;;  %v715_v55 = vpack.c.bf16 %v711_v52, %v2375_v47  ;;  %v2039_v47 = vld [vmem:[#allocation6 + $0x30] sm:$0xff]  }
  0x5c   : > { %686 = vmatprep.subr.bf16.mxu1 %v1990_v58 }
  0x5d   : > { %v747_v58 = vrot.slane %v713_v54, 1  ;;  %v748_v59 = vrot.slane %v715_v55, 1 }
  0x5e   : > { %510 = vmatpush2.bf16.msra.mxu0 %v1992_v61  ;;  %v2037_v61 = vld [vmem:[#allocation6 + $0x38] sm:$0xff]  }
  0x5f   : > { %687 = vmatpush2.bf16.msra.mxu1 %v1993_v63  ;;  %511 = vmatprep.subr.bf16.mxu0 %v1994_v1  ;;  %v749_v60 = vsel %vm746_vm2, %v747_v58, %v748_v59  ;;  %v2036_v63 = vld [vmem:[#allocation6 + $0x98] sm:$0xff]   ;;  %v2038_v1 = vld [vmem:[#allocation6 + $0x90] sm:$0xff]   ;;  %v940_v58 = vlaneseq }
  0x60   : > { %688 = vmatprep.subr.bf16.mxu1 %v1996_v5  ;;  %v2042_v5 = vld [vmem:[#allocation6 + $0x80] sm:$0xff]  }
  0x62   : > { %512 = vmatpush2.bf16.msra.mxu0 %v1998_v7  ;;  %v2044_v7 = vld [vmem:[#allocation6 + $0x78] sm:$0xff]  }
  0x63   : > { %689 = vmatpush2.bf16.msra.mxu1 %v1999_v8  ;;  %881 = vmatprep.subr.bf16.mxu0 %v2002_v13  ;;  %v2049_v8 = vld [vmem:[#allocation6 + $0x8] sm:$0xff]   ;;  %v2050_v13 = vld [vmem:[#allocation6 + $0x60] sm:$0xff]  }
  0x64   : > { %1179 = vmatprep.subr.bf16.mxu1 %v2229_v62 }
  0x65   : > { %514 = vmatmul.mubr.bf16.vlgmr.msra.gmra.mxu0 %v333_v16  ;;  %v2052_v16 = vld [vmem:[#allocation6 + $0xb8] sm:$0xff]  }
  0x66   : > { %691 = vmatmul.mubr.bf16.vlgmr.msra.gmra.mxu1 %v260_v14  ;;  %882 = vmatpush1.bf16.msra.mxu0 %v2000_v17  ;;  %v2055_v14 = vld [vmem:[#allocation6 + $0x50] sm:$0xff]  }
  0x67   : > { %1755 = vmatprep.mubr.msk.bf16.mxu0 %vm474_vm0, %v351_v15  ;;  %883 = vmatprep.subr.bf16.mxu0 %v2005_v18  ;;  %v1001_v15 = vld [vmem:[%s2357_s9 + $0x8] sm:$0xfe]  ;;  %v2057_v18 = vld [vmem:[#allocation6 + $0x48] sm:$0xff]  }
  0x68   : > { %1781 = vmatprep.mubr.msk.bf16.mxu1 %vm474_vm0, %v263_v19  ;;  %1180 = vmatpush1.bf16.msra.mxu1 %v2036_v63  ;;  %v1020_v17 = vpack.c.bf16 %v2360_v38, %v1001_v15  ;;  %v1003_v19 = vld [vmem:[%s2357_s9 + $0x28] sm:$0x1] }
  0x69   : > { %1181 = vmatprep.subr.bf16.mxu1 %v2229_v62 }
  0x6a   : > { %884 = vmatpush1.bf16.msra.mxu0 %v2003_v21  ;;  %v1021_v21 = vpack.c.bf16 %v1003_v19, %v1003_v19  ;;  %v1233_v22 = vshrl.u32 %v1020_v17, 16  ;;  %v1235_v23 = vshll.u32 %v1020_v17, 16 }
  0x6b   : > { %885 = vmatprep.subr.bf16.mxu0 %v2008_v24  ;;  %v2059_v24 = vld [vmem:[#allocation6 + $0x40] sm:$0xff]  }
  0x6c   : > { %1182 = vmatpush1.bf16.msra.mxu1 %v2038_v1  ;;  %v1240_v30 = vshll.u32 %v1021_v21, 16 }
  0x6d   : > { %524 = vmatmul.mubr.bf16.gmra.mxu0 %v348_v28  ;;  %1183 = vmatprep.subr.bf16.mxu1 %v2229_v62  ;;  %v1067_v28 = vpack.c.bf16 %v1049_v26, %v1049_v26 }
  0x6e   : > { %701 = vmatmul.mubr.bf16.gmra.mxu1 %v262_v29  ;;  %886 = vmatpush1.bf16.msra.mxu0 %v2006_v27  ;;  %v1066_v27 = vpack.c.bf16 %v2360_v38, %v1048_v25  ;;  %v1237_v29 = vrot.slane %v1235_v23, 1 }
  0x6f   : > { %1806 = vmatprep.mubr.msk.bf16.mxu0 %vm474_vm0, %v752_v33  ;;  %887 = vmatprep.subr.bf16.mxu0 %v2011_v32  ;;  %v1101_v33 = vrot.slane %v1067_v28, 1 }
  0x70   : > { %1184 = vmatpush1.bf16.msra.mxu1 %v2040_v3  ;;  %v1100_v32 = vrot.slane %v1066_v27, 1 }
  0x71   : > { %1185 = vmatprep.subr.bf16.mxu1 %v2229_v62 }
  0x72   : > { %888 = vmatpush1.bf16.msra.mxu0 %v2009_v34  ;;  %v1238_v34 = vor.u32 %v1237_v29, %v1233_v22 }
  0x73   : > { %889 = vmatprep.subr.bf16.mxu0 %v2014_v35  ;;  %v1242_v35 = vrot.slane %v1240_v30, 1 }
  0x74   : > { %1186 = vmatpush1.bf16.msra.mxu1 %v2042_v5 }
  0x75   : > { %1187 = vmatprep.subr.bf16.mxu1 %v2229_v62 }
  0x76   : > { %890 = vmatpush1.bf16.msra.mxu0 %v2012_v36  ;;  %v1102_v36 = vsel %vm746_vm2, %v1100_v32, %v1101_v33 }
  0x77   : > { %891 = vmatprep.subr.bf16.mxu0 %v2017_v37  ;;  %v1243_v37 = vsel %vm321_vm1, %v1238_v34, %v1242_v35  ;;  %1826 = vmatprep.mubr.msk.bf16.mxu1 %vm474_vm0, %v1102_v36 }
  0x78   : > { %1188 = vmatpush1.bf16.msra.mxu1 %v2044_v7 }
  0x79   : > { %1189 = vmatprep.subr.bf16.mxu1 %v2229_v62 }
  0x7a   : > { %892 = vmatpush1.bf16.msra.mxu0 %v2015_v39  ;;  %v2058_v39 = vld [vmem:[#allocation6 + $0xa0] sm:$0xff]  }
  0x7b   : > { %893 = vmatprep.subr.bf16.mxu0 %v2020_v40 }
  0x7c   : > { %1190 = vmatpush1.bf16.msra.mxu1 %v2046_v9 }
  0x7d   : > { %1191 = vmatprep.subr.bf16.mxu1 %v2229_v62 }
  0x7e   : > { %894 = vmatpush1.bf16.msra.mxu0 %v2018_v41 }
  0x7f   : > { %895 = vmatprep.subr.bf16.mxu0 %v2023_v42 }
  0x80   : > { %1192 = vmatpush1.bf16.msra.mxu1 %v2048_v11 }
  0x81   : > { %1193 = vmatprep.subr.bf16.mxu1 %v2229_v62 }
  0x82   : > { %896 = vmatpush1.bf16.msra.mxu0 %v2021_v43 }
  0x83   : > { %905 = vmatprep.subr.bf16.mxu0 %v2026_v45 }
  0x84   : > { %1194 = vmatpush1.bf16.msra.mxu1 %v2050_v13 }
  0x85   : > { %1203 = vmatprep.subr.bf16.mxu1 %v2229_v62 }
  0x86   : > { %906 = vmatpush2.bf16.msra.mxu0 %v2024_v46 }
  0x87   : > { %907 = vmatprep.subr.bf16.mxu0 %v2029_v48 }
  0x88   : > { %1204 = vmatpush2.bf16.msra.mxu1 %v2052_v16 }
  0x89   : > { %1205 = vmatprep.subr.bf16.mxu1 %v2229_v62 }
  0x8a   : > { %908 = vmatpush2.bf16.msra.mxu0 %v2027_v49 }
  0x8b   : > { %909 = vmatprep.subr.bf16.mxu0 %v2032_v50 }
  0x8c   : > { %1206 = vmatpush2.bf16.msra.mxu1 %v2054_v20 }
  0x8d   : > { %1207 = vmatprep.subr.bf16.mxu1 %v2229_v62 }
  0x8e   : > { %910 = vmatpush2.bf16.msra.mxu0 %v2030_v53 }
  0x8f   : > { %911 = vmatprep.subr.bf16.mxu0 %v2035_v56 }
  0x92   : > { %912 = vmatpush2.bf16.msra.mxu0 %v2033_v57 }
  0x93   : > { %1320 = vmatprep.subr.bf16.mxu0 %v2229_v62 }
  0x95   : > { %914 = vmatmul.mubr.bf16.vlgmr.msra.gmra.mxu0 %v749_v60 }
  0x96   : > { %1807 = vmatprep.mubr.msk.bf16.mxu0 %vm474_vm0, %v751_v31  ;;  %1321 = vmatpush1.bf16.msra.mxu0 %v2037_v61  ;;  %v2056_v31 = vld [vmem:[#allocation6 + $0xa8] sm:$0xff]   ;;  %v938_v61 = vld [vmem:[%s2570_s3] sm:$0x3] }
  0x97   : > { %1322 = vmatprep.subr.bf16.mxu0 %v2229_v62  ;;  %1208 = vmatpush2.bf16.msra.mxu1 %v2056_v31 }
  0x98   : > { %1209 = vmatprep.subr.bf16.mxu1 %v2229_v62 }
  0x9a   : > { %1323 = vmatpush1.bf16.msra.mxu0 %v2039_v47 }
  0x9b   : > { %1324 = vmatprep.subr.bf16.mxu0 %v2229_v62  ;;  %1210 = vmatpush2.bf16.msra.mxu1 %v2058_v39 }
  0x9c   : > { %1519 = vmatprep.subr.bf16.mxu1 %v2229_v62 }
  0x9d   : > { %924 = vmatmul.mubr.bf16.gmra.mxu0 %v748_v59  ;;  %v941_v59 = vshrl.u32 %v940_v58, 7 }
  0x9e   : > { %1325 = vmatpush1.bf16.msra.mxu0 %v2041_v0  ;;  %1839 = vmatprep.mubr.msk.bf16.mxu0 %vm474_vm0, %v1243_v37 }
  0x9f   : > { %1326 = vmatprep.subr.bf16.mxu0 %v2229_v62  ;;  %v942_v60 = vsub.s32 0, %v941_v59  ;;  %v946_v47 = vsub.s32 1, %v941_v59 }
  0xa1   : > { %v943_v0 = vrot.slane %v938_v61, %v942_v60 }
  0xa2   : > { %1327 = vmatpush1.bf16.msra.mxu0 %v2043_v2 }
  0xa3   : > { %1328 = vmatprep.subr.bf16.mxu0 %v2229_v62 }
  0xa6   : > { %1329 = vmatpush1.bf16.msra.mxu0 %v2045_v4  ;;  %v947_v4 = vrot.slane %v938_v61, %v946_v47 }
  0xa7   : > { %1330 = vmatprep.subr.bf16.mxu0 %v2229_v62 }
  0xaa   : > { %1331 = vmatpush1.bf16.msra.mxu0 %v2047_v6 }
  0xab   : > { %1332 = vmatprep.subr.bf16.mxu0 %v2229_v62 }
  0xae   : > { %1333 = vmatpush1.bf16.msra.mxu0 %v2049_v8 }
  0xaf   : > { %1334 = vmatprep.subr.bf16.mxu0 %v2229_v62 }
  0xb2   : > { %1335 = vmatpush1.bf16.msra.mxu0 %v2051_v10 }
  0xb3   : > { %1344 = vmatprep.subr.bf16.mxu0 %v2229_v62 }
  0xb6   : > { %1345 = vmatpush2.bf16.msra.mxu0 %v2053_v12 }
  0xb7   : > { %1346 = vmatprep.subr.bf16.mxu0 %v2229_v62 }
  0xba   : > { %1347 = vmatpush2.bf16.msra.mxu0 %v2055_v14 }
  0xbb   : > { %1348 = vmatprep.subr.bf16.mxu0 %v2229_v62 }
  0xbe   : > { %1349 = vmatpush2.bf16.msra.mxu0 %v2057_v18 }
  0xbf   : > { %1350 = vmatprep.subr.bf16.mxu0 %v2229_v62 }
  0xc2   : > { %1351 = vmatpush2.bf16.msra.mxu0 %v2059_v24 }
 0x125   : > { %v515_v40 = vpop.f32.mrf.mxu0 }
 0x126   : > { %v692_v41 = vpop.f32.mrf.mxu1 }
 0x127   : > { %v517_v42 = vpop.f32.mrf.mxu0  ;;  %v693_v63 = vadd.f32 %v692_v41, %v515_v40 }
 0x128   : > { %v694_v43 = vpop.f32.mrf.mxu1 }
 0x129   : > { %v519_v45 = vpop.f32.mrf.mxu0  ;;  %v695_v2 = vadd.f32 %v694_v43, %v517_v42 }
 0x12a   : > { %v696_v46 = vpop.f32.mrf.mxu1 }
 0x12b   : > { %v521_v48 = vpop.f32.mrf.mxu0  ;;  %v697_v6 = vadd.f32 %v696_v46, %v519_v45 }
 0x12c   : > { %v698_v49 = vpop.f32.mrf.mxu1 }
 0x12d   : > { %v525_v50 = vpop.f32.mrf.mxu0  ;;  %v699_v10 = vadd.f32 %v698_v49, %v521_v48 }
 0x12e   : > { %v702_v51 = vpop.f32.mrf.mxu1 }
 0x12f   : > { %v527_v52 = vpop.f32.mrf.mxu0  ;;  %v703_v14 = vadd.f32 %v702_v51, %v525_v50  ;;  %v1000_v51 = vld [vmem:[%s2357_s9 + $0x20] sm:$0x1] }
 0x130   : > { %v704_v53 = vpop.f32.mrf.mxu1 }
 0x131   : > { %v529_v54 = vpop.f32.mrf.mxu0  ;;  %v705_v19 = vadd.f32 %v704_v53, %v527_v52  ;;  %v1363_v53 = vld [vmem:[%s2357_s9 + $0x8] sm:$0xf8] }
 0x132   : > { %v706_v55 = vpop.f32.mrf.mxu1  ;;  %v1381_v60 = vpack.c.bf16 %v2360_v38, %v1363_v53  ;;  %v2062_v53 = vld [vmem:[#allocation6 + $0xe8] sm:$0xff]  }
 0x133   : > { %v530_v56 = vpop.f32.mrf.mxu0  ;;  %v998_v55 = vld [vmem:[%s2357_s9] sm:$0xfe] }
 0x134   : > { %v707_v57 = vpop.f32.mrf.mxu1  ;;  %v1364_v56 = vld [vmem:[%s2357_s9 + $0x28] sm:$0x7]  ;;  %v1427_v38 = vshrl.u32 %v1381_v60, 16 }
 0x155   : > { %v915_v1 = vpop.f32.mrf.mxu0 }
 0x156   : > { %v932_v3 = vadd.f32 %v915_v1, %v693_v63  ;;  %v1382_v1 = vpack.c.bf16 %v1364_v56, %v1364_v56  ;;  %v2064_v56 = vld [vmem:[#allocation6 + $0xd8] sm:$0xff]  }
 0x157   : > { %v917_v5 = vpop.f32.mrf.mxu0 }
 0x158   : > { %v950_v7 = vadd.f32 %v943_v0, %v932_v3  ;;  %v933_v8 = vadd.f32 %v917_v5, %v695_v2 }
 0x159   : > { %v919_v9 = vpop.f32.mrf.mxu0 }
 0x15a   : > { %v1808_v11 = vmul.f32 -1.442695, %v950_v7  ;;  %v951_v12 = vadd.f32 %v947_v4, %v933_v8  ;;  %v934_v13 = vadd.f32 %v919_v9, %v697_v6 }
 0x15b   : > { %v921_v15 = vpop.f32.mrf.mxu0 }
 0x15c   : > { %2072 = vpow2.f32 %v1808_v11  ;;  %v1809_v16 = vmul.f32 -1.442695, %v951_v12  ;;  %v952_v17 = vadd.f32 %v943_v0, %v934_v13  ;;  %v935_v18 = vadd.f32 %v921_v15, %v699_v10  ;;  %v2461_v13 = vld [vmem:[%s2357_s9] sm:$0xfc] }
 0x15d   : > { %v925_v20 = vpop.f32.mrf.mxu0  ;;  %v1430_v11 = vshll.u32 %v1381_v60, 16  ;;  %v1435_v12 = vshrl.u32 %v1382_v1, 16 }
 0x15e   : > { %2074 = vpow2.f32 %v1809_v16  ;;  %v1810_v21 = vmul.f32 -1.442695, %v952_v17  ;;  %v953_v22 = vadd.f32 %v947_v4, %v935_v18  ;;  %v936_v23 = vadd.f32 %v925_v20, %v703_v14 }
 0x15f   : > { %v927_v24 = vpop.f32.mrf.mxu0  ;;  %v1438_v17 = vshll.u32 %v1382_v1, 16 }
 0x160   : > { %2076 = vpow2.f32 %v1810_v21  ;;  %v1811_v25 = vmul.f32 -1.442695, %v953_v22  ;;  %v954_v26 = vadd.f32 %v943_v0, %v936_v23  ;;  %v937_v27 = vadd.f32 %v927_v24, %v705_v19 }
 0x161   : > { %v929_v28 = vpop.f32.mrf.mxu0  ;;  %v1429_v21 = vrot.slane %v1427_v38, 1 }
 0x162   : > { %2078 = vpow2.f32 %v1811_v25  ;;  %v1812_v29 = vmul.f32 -1.442695, %v954_v26  ;;  %v955_v30 = vadd.f32 %v947_v4, %v937_v27  ;;  %v1047_v27 = vld [vmem:[%s2357_s9 + $0x20] sm:$0x3] }
 0x163   : > { %v930_v31 = vpop.f32.mrf.mxu0 }
 0x164   : > { %2080 = vpow2.f32 %v1812_v29  ;;  %v1813_v32 = vmul.f32 -1.442695, %v955_v30  ;;  %v1432_v29 = vrot.slane %v1430_v11, 2  ;;  %v1437_v30 = vrot.slane %v1435_v12, 1 }
 0x165   : > { %v1440_v31 = vrot.slane %v1438_v17, 2 }
 0x166   : > { %2082 = vpow2.f32 %v1813_v32 }
 0x169   : > { %v2073_v33 = vpop.eup %2072 }
 0x16a   : > { %v974_v34 = vadd.f32 1.0, %v2073_v33 }
 0x16b   : > { %v2075_v35 = vpop.eup %2074 }
 0x16c   : > { %2084 = vrcp.f32 %v974_v34  ;;  %v975_v36 = vadd.f32 1.0, %v2075_v35 }
 0x16d   : > { %v2077_v37 = vpop.eup %2076 }
 0x16e   : > { %2086 = vrcp.f32 %v975_v36  ;;  %v976_v39 = vadd.f32 1.0, %v2077_v37 }
 0x16f   : > { %v2079_v40 = vpop.eup %2078 }
 0x170   : > { %2088 = vrcp.f32 %v976_v39  ;;  %v977_v41 = vadd.f32 1.0, %v2079_v40  ;;  %v1433_v40 = vor.u32 %v1432_v29, %v1429_v21 }
 0x171   : > { %v2081_v42 = vpop.eup %2080 }
 0x172   : > { %2090 = vrcp.f32 %v977_v41  ;;  %v978_v43 = vadd.f32 1.0, %v2081_v42  ;;  %v1441_v41 = vor.u32 %v1440_v31, %v1437_v30 }
 0x173   : > { %v2083_v45 = vpop.eup %2082 }
 0x174   : > { %2092 = vrcp.f32 %v978_v43  ;;  %v979_v46 = vadd.f32 1.0, %v2083_v45 }
 0x176   : > { %2094 = vrcp.f32 %v979_v46 }
 0x179   : > { %v2085_v48 = vpop.eup %2084 }
 0x17a   : > { %992 = vst [vmem:[#allocation2 + $0x28] sm:$0xff] %v2085_v48  ;;  %v1009_v52 = vrot.slane %v2085_v48, 7 }
 0x17b   : > { %v2087_v49 = vpop.eup %2086 }
 0x17c   : > { %993 = vst [vmem:[#allocation2 + $0x10] sm:$0xff] %v2087_v49  ;;  %v1015_v63 = vmul.f32 %v1009_v52, %v998_v55  ;;  %v2060_v49 = vld [vmem:[#allocation6 + $0xf8] sm:$0xff]   ;;  %v2063_v55 = vld [vmem:[#allocation6 + $0xe0] sm:$0xff]  }
 0x17d   : > { %v2089_v50 = vpop.eup %2088 }
 0x17e   : > { %v2445_v54 = vrot.slane %v2089_v50, 7  ;;  %v1442_v50 = vsel %vm1408_vm4, %v1433_v40, %v1441_v41 }
 0x17f   : > { %v2449_v57 = vpop.eup %2090 }
 0x180   : > { %v1011_v58 = vsel %vm1008_vm3, %v1009_v52, %v2445_v54  ;;  %v1017_v59 = vmul.f32 %v2445_v54, %v1000_v51  ;;  %v1577_v3 = vsub.f32 1.0, %v2449_v57  ;;  %v2061_v52 = vld [vmem:[#allocation6 + $0xf0] sm:$0xff]  }
 0x181   : > { %v2093_v61 = vpop.eup %2092  ;;  %v1050_v47 = vld [vmem:[#allocation2 + $0x28] sm:$0xfe]  ;;  %v1016_v0 = vmul.f32 %v1011_v58, %v2370_v44  ;;  %v2065_v58 = vld [vmem:[#allocation6 + $0xd0] sm:$0xff]  }
 0x182   : > { %996 = vst [vmem:[#allocation2 + $0x18] sm:$0xff] %v2093_v61  ;;  %v1054_v2 = vrot.slane %v1050_v47, 7  ;;  %v1019_v4 = vpack.c.bf16 %v1017_v59, %v1017_v59  ;;  %v1583_v16 = vrot.slane %v1577_v3, 7  ;;  %v1365_v60 = vld [vmem:[#allocation2 + $0x28] sm:$0xfc]  ;;  %v2066_v47 = vld [vmem:[#allocation6 + $0xc8] sm:$0xff]  }
 0x183   : > { %v2095_v5 = vpop.eup %2094  ;;  %v2457_v6 = vld [vmem:[#allocation2 + $0x10] sm:$0xfe]  ;;  %v1018_v7 = vpack.c.bf16 %v1016_v0, %v1015_v63  ;;  %v1369_v63 = vrot.slane %v1365_v60, 7  ;;  %v1362_v0 = vld [vmem:[%s2357_s9 + $0x20] sm:$0x7] }
 0x184   : > { %997 = vst [vmem:[#allocation2 + $0x20] sm:$0xff] %v2095_v5  ;;  %v1576_v8 = vsub.f32 1.0, %v2457_v6  ;;  %v1228_v10 = vshll.u32 %v1019_v4, 16  ;;  %v1055_v14 = vsel %vm1008_vm3, %v1054_v2, %v2445_v54  ;;  %v1061_v23 = vmul.f32 %v1054_v2, %v2461_v13  ;;  %v2067_v2 = vld [vmem:[#allocation6 + $0xc0] sm:$0xff]   ;;  %v1361_v3 = vld [vmem:[%s2357_s9] sm:$0xf8] }
 0x185   : > { %v1223_v9 = vshll.u32 %v1018_v7, 16  ;;  %v1221_v18 = vshrl.u32 %v1018_v7, 16  ;;  %v1062_v24 = vmul.f32 %v1055_v14, %v2370_v44  ;;  %v1370_v4 = vsel %vm1008_vm3, %v1369_v63, %v2445_v54  ;;  %v2068_v7 = vld [vmem:[#allocation6 + $0x118] sm:$0xff]  }
 0x186   : > { %v2465_v15 = vrot.slane %v1576_v8, 7  ;;  %v1230_v26 = vrot.slane %v1228_v10, 1  ;;  %v1376_v8 = vmul.f32 %v1369_v63, %v1361_v3  ;;  %v1377_v38 = vmul.f32 %v1370_v4, %v2370_v44  ;;  %v2069_v10 = vld [vmem:[#allocation6 + $0x110] sm:$0xff]   ;;  %v2071_v44 = vld [vmem:[#allocation6 + $0x100] sm:$0xff]  }
 0x187   : > { %v1225_v19 = vrot.slane %v1223_v9, 1  ;;  %v1064_v37 = vpack.c.bf16 %v1062_v24, %v1061_v23 }
 0x188   : > { %v2469_v20 = vsel %vm1008_vm3, %v2465_v15, %v1583_v16  ;;  %v1379_v11 = vpack.c.bf16 %v1377_v38, %v1376_v8 }
 0x189   : > { %v1051_v22 = vld [vmem:[#allocation2 + $0x18] sm:$0x1]  ;;  %v1226_v25 = vor.u32 %v1225_v19, %v1221_v18  ;;  %v1097_v45 = vrot.slane %v1064_v37, 1 }
 0x18a   : > { %v1056_v28 = vrot.slane %v1051_v22, 7  ;;  %v1366_v59 = vld [vmem:[#allocation2 + $0x18] sm:$0x3]  ;;  %v1410_v17 = vshrl.u32 %v1379_v11, 16 }
 0x18b   : > { %v2474_v32 = vld [vmem:[#allocation2 + $0x20] sm:$0x1]  ;;  %v1231_v33 = vsel %vm321_vm1, %v1226_v25, %v1230_v26  ;;  %v1371_v61 = vrot.slane %v1366_v59, 7 }
 0x18c   : > { %v1057_v34 = vsel %vm1008_vm3, %v2445_v54, %v1056_v28  ;;  %v1578_v35 = vsub.f32 1.0, %v2474_v32  ;;  %1353 = vmatmul.mubr.bf16.vlgmr.msra.gmra.mxu0 %v1231_v33  ;;  %v1412_v21 = vrot.slane %v1410_v17, 1 }
 0x18d   : > { %v1063_v36 = vmul.f32 %v1057_v34, %v1047_v27  ;;  %v1372_v1 = vsel %vm1008_vm3, %v2445_v54, %v1371_v61  ;;  %v1413_v54 = vshll.u32 %v1379_v11, 16 }
 0x18e   : > { %v1585_v39 = vrot.slane %v1578_v35, 7  ;;  %v1378_v5 = vmul.f32 %v1372_v1, %v1362_v0 }
 0x18f   : > { %v1065_v42 = vpack.c.bf16 %v1063_v36, %v1063_v36  ;;  %v1415_v22 = vrot.slane %v1413_v54, 2 }
 0x190   : > { %v1586_v43 = vsel %vm1008_vm3, %v1583_v16, %v1585_v39  ;;  %v1380_v9 = vpack.c.bf16 %v1378_v5, %v1378_v5  ;;  %v2070_v16 = vld [vmem:[#allocation6 + $0x108] sm:$0xff]  }
 0x191   : > { %v1098_v46 = vrot.slane %v1065_v42, 1  ;;  %v2481_v48 = vmul.f32 %v1586_v43, %v1047_v27  ;;  %v1416_v24 = vor.u32 %v1415_v22, %v1412_v21 }
 0x192   : > { %v1418_v12 = vshrl.u32 %v1380_v9, 16  ;;  %v1421_v14 = vshll.u32 %v1380_v9, 16 }
 0x193   : > { %v1099_v51 = vsel %vm746_vm2, %v1097_v45, %v1098_v46 }
 0x194   : > { %1212 = vmatmul.mubr.bf16.vlgmr.msra.gmra.mxu1 %v1099_v51  ;;  %v1420_v18 = vrot.slane %v1418_v12, 1  ;;  %v1423_v19 = vrot.slane %v1421_v14, 2 }
 0x195   : > { %1520 = vmatpush1.bf16.msra.mxu1 %v2060_v49  ;;  %1852 = vmatprep.mubr.msk.bf16.mxu1 %vm474_vm0, %v1442_v50  ;;  %v1597_v49 = vrot.slane %v2457_v6, 1  ;;  %v1598_v50 = vrot.slane %v2449_v57, 1 }
 0x196   : > { %1521 = vmatprep.subr.bf16.mxu1 %v2229_v62  ;;  %v1424_v23 = vor.u32 %v1423_v19, %v1420_v18 }
 0x198   : > { %v1425_v25 = vsel %vm1408_vm4, %v1416_v24, %v1424_v23 }
 0x199   : > { %1522 = vmatpush1.bf16.msra.mxu1 %v2061_v52  ;;  %v1600_v52 = vrot.slane %v2474_v32, 1  ;;  %v2100_v32 = vld [vmem:[%s2357_s9 + $0x10] sm:$0xff]  ;;  %s2159_s9 = scalar_lea.vmem %s2158_s8, 512 }
 0x19a   : > { %1523 = vmatprep.subr.bf16.mxu1 %v2229_v62  ;;  %p2161_p0 = scmp.lt.s32.totalorder %s2159_s9, %s2153_s6 }
 0x19b   : > { %v1601_v60 = vsel %vm746_vm2, %v1598_v50, %v1600_v52 }
 0x19c   : > { %p2162_p1 = por %p2161_p0, %p2160_p11 }
 0x19d   : > { %1524 = vmatpush1.bf16.msra.mxu1 %v2062_v53  ;;  %v1599_v53 = vsel %vm746_vm2, %v1597_v49, %v1598_v50 }
 0x19e   : > { %1525 = vmatprep.subr.bf16.mxu1 %v2229_v62  ;;  %p2163_p3 = pnand %p2162_p1, %p2156_p8 }
 0x1a1   : > { %1526 = vmatpush1.bf16.msra.mxu1 %v2063_v55 }
 0x1a2   : > { %1527 = vmatprep.subr.bf16.mxu1 %v2229_v62 }
 0x1a5   : > { %1528 = vmatpush1.bf16.msra.mxu1 %v2064_v56  ;;  %v1590_v56 = vmul.f32 %v2465_v15, %v2461_v13 }
 0x1a6   : > { %1529 = vmatprep.subr.bf16.mxu1 %v2229_v62 }
 0x1a9   : > { %1530 = vmatpush1.bf16.msra.mxu1 %v2065_v58 }
 0x1aa   : > { %1531 = vmatprep.subr.bf16.mxu1 %v2229_v62 }
 0x1ad   : > { %1532 = vmatpush1.bf16.msra.mxu1 %v2066_v47  ;;  %v1591_v47 = vmul.f32 %v2100_v32, %v2469_v20 }
 0x1ae   : > { %1533 = vmatprep.subr.bf16.mxu1 %v2229_v62 }
 0x1b1   : > { %1534 = vmatpush1.bf16.msra.mxu1 %v2067_v2 }
 0x1b2   : > { %1543 = vmatprep.subr.bf16.mxu1 %v2229_v62 }
 0x1b5   : > { %1544 = vmatpush2.bf16.msra.mxu1 %v2068_v7 }
 0x1b6   : > { %1545 = vmatprep.subr.bf16.mxu1 %v2229_v62 }
 0x1b9   : > { %1546 = vmatpush2.bf16.msra.mxu1 %v2069_v10 }
 0x1ba   : > { %1547 = vmatprep.subr.bf16.mxu1 %v2229_v62 }
 0x1bd   : > { %1548 = vmatpush2.bf16.msra.mxu1 %v2070_v16 }
 0x1be   : > { %1549 = vmatprep.subr.bf16.mxu1 %v2229_v62  ;;  %v1853_v62 = vld [vmem:[%s2571_s4] ss:$0 sm:$0xff] }
 0x1c1   : > { %1550 = vmatpush2.bf16.msra.mxu1 %v2071_v44 }
 0x1c4   : > { %1552 = vmatmul.mubr.bf16.vlgmr.msra.gmra.mxu1 %v1425_v25 }
 0x24c   : > { %v1354_v26 = vpop.f32.mrf.mxu0 }
 0x24e   : > { %v1356_v27 = vpop.f32.mrf.mxu0 }
 0x250   : > { %v1357_v28 = vpop.f32.mrf.mxu0 }
 0x252   : > { %v1359_v29 = vpop.f32.mrf.mxu0 }
 0x254   : > { %v1213_v30 = vpop.f32.mrf.mxu1 }
 0x255   : > { %v1355_v35 = vadd.f32 %v1354_v26, %v1213_v30 }
 0x256   : > { %v1215_v31 = vpop.f32.mrf.mxu1 }
 0x258   : > { %v1216_v33 = vpop.f32.mrf.mxu1 }
 0x259   : > { %v1358_v40 = vadd.f32 %v1357_v28, %v1216_v33 }
 0x25a   : > { %v1218_v34 = vpop.f32.mrf.mxu1 }
 0x284   : > { %v1553_v36 = vpop.f32.mrf.mxu1 }
 0x285   : > { %v1560_v37 = vadd.f32 %v1553_v36, %v1355_v35 }
 0x286   : > { %v1555_v39 = vpop.f32.mrf.mxu1 }
 0x287   : > { %v1569_v41 = vadd.f32 %v1853_v62, %v1560_v37 }
 0x288   : > { %v1556_v42 = vpop.f32.mrf.mxu1 }
 0x289   : > { %2096 = vtanh.f32 %v1569_v41  ;;  %v1561_v43 = vadd.f32 %v1556_v42, %v1358_v40 }
 0x28a   : > { %v1558_v45 = vpop.f32.mrf.mxu1 }
 0x28b   : > { %v1570_v46 = vadd.f32 %v1853_v62, %v1561_v43 }
 0x28d   : > { %2098 = vtanh.f32 %v1570_v46 }
 0x296   : > { %v2097_v51 = vpop.eup %2096 }
 0x297   : > { %v1604_v55 = vmul.f32 %v2097_v51, %v1599_v53 }
 0x299   : > { %v1609_v58 = vrot.slane %v1604_v55, 6 }
 0x29a   : > { %v2099_v59 = vpop.eup %2098 }
 0x29b   : > { %v1615_v61 = vadd.f32 %v1609_v58, %v1590_v56  ;;  %v1605_v6 = vmul.f32 %v2099_v59, %v1601_v60 }
 0x29d   : > { %v1610_v57 = vrot.slane %v1605_v6, 6  ;;  %1618 = vst [vmem:[%s247_s17 - $0x2] sm:$0xfc] %v1615_v61 }
 0x29f   : > { %v1611_v63 = vsel %vm1608_vm5, %v1609_v58, %v1610_v57  ;;  %v1617_v0 = vadd.f32 %v1610_v57, %v2481_v48 }
 0x2a0   : > { %v1616_v13 = vadd.f32 %v1611_v63, %v1591_v47 }
 0x2a1   : > { %1620 = vst [vmem:[%s247_s17 + $0xe] sm:$0x3] %v1617_v0 }
 0x2a2   : > { %1619 = vst [vmem:[%s247_s17 + $0x6] sm:$0xff] %v1616_v13 }
 0x2a3   : > { %2166 = shalt.err (!%p2163_p3)
}
 0x2a4   : > { %s2167_s10 = scalar_lea.hbm %s2523_s30, 256  ;;  %s2171_s13 = scalar_lea.hbm %s2572_s5, 512 }
 0x2a5   : > { %p2168_p2 = scmp.ne.s32.totalorder %s2523_s30, %s2167_s10  ;;  %p2172_p6 = scmp.lt.s32.totalorder %s2523_s30, %s2572_s5 }
 0x2a6   : > { %p2173_p9 = scmp.lt.s32.totalorder %s2171_s13, %s2167_s10 }
 0x2a7   : > { %p2169_p4 = pnand %p2168_p2, %p2301_p5 }
 0x2a8   : > { %p2174_p10 = por %p2173_p9, %p2172_p6 }
 0x2a9   : > { %p2170_p13 = pneg %p2169_p4 }
 0x2ab   : > { %p2175_p12 = pnand %p2174_p10, %p2170_p13 }
 0x2ad   : > { %2178 = shalt.err (!%p2175_p12)
}
 0x2ae   : > { %s2231_s16 = smov 128   ;;  %s2232_s17 = smov 8  }
 0x2af   : > { %1869 = dma.vmem_to_hbm [thread:$0]  (%p2301_p5), %s2525_s23, 256, %s2523_s30, %s2527_s22, %s2231_s16, %s2231_s16, %s2232_s17  }
 0x2b0 PF: > { %p1886_p7 = scmp.ge.s32.totalorder %s2221_s21, 2  ;;  %s1650_s25 = sand.u32 1, %s2209_s18  }
 0x2b1   : > { %p2582_p8 = scmp.ne.s32.totalorder %s2575_s29, 0  ;;  %s1651_s26 = scalar_lea.sflag [#allocation5], %s1650_s25 }
 0x2b3   : > { %p1879_p11 = pnand %p1886_p7, %p2582_p8 }
 0x2b5   : > { %p1880_p0 = pneg %p1879_p11 }
 0x2b7   : > { %2204 = dma.done.wait (%p1880_p0), %s1651_s26, 256  }
 0x2b8   : > { %2206 = vsyncadd (%p1880_p0), %s1651_s26, 4294967040  ;;  %p17_p1 = scmp.ge.s32.totalorder %s2288_s24, 4   ;;  %s2583_s18 = smov %s2213_s19 }
 0x2b9   : > { %s2584_s19 = smov %s2217_s20  ;;  %s2585_s20 = smov %s2299_s27 }
 0x2ba   : > { %s2586_s21 = smov %s2288_s24  ;;  %19 = sbr.rel (!%p17_p1) target bundleno = 5 (0x5), region = 88 }
 0x2bf   :  { %1656 = vsyncpa [#allocation4], 1 }
 0x2c0   :  { %1658 = vsyncpa [#allocation4 + $0x1], 1 }
 0x2c1   :  { %1659 = vsyncpa [#allocation7], 1 }
 0x2c2   :  { %1660 = vsyncpa [#allocation5], 1 }
 0x2c3   :  { %1662 = vsyncpa [#allocation5 + $0x1], 1 }

</bundles_post_ra>
